<compile_context>
chip_gen: v7x
topology: tpu7x:2x2x1
jax: 0.10.0
libtpu: 0.0.40
codegen_flags: <defaults>
</compile_context>

<pallas_src>
import functools

import jax
import jax.numpy as jnp
from jax.experimental import pallas as pl
from jax.experimental.pallas import tpu as pltpu

BN_EPS = 1e-5
LANE = 128          # TPU lane width; output channels padded to a multiple of this
TK_CAP = 1024       # max K (reduction) chunk per grid step


def _round_up(x, m):
    return ((x + m - 1) // m) * m


def _cdiv(a, b):
    return -(-a // b)


# ---------------------- per-generation hardware sizing ----------------------
def _tpu_hw():
    vmem = None
    try:
        vmem = int(pltpu.get_tpu_info().vmem_capacity_bytes)
    except Exception:
        vmem = None
    kind = ""
    try:
        kind = jax.devices()[0].device_kind.lower()
    except Exception:
        pass
    num_tc = 2 if "v7" in kind else 1               # v7x: 2 TensorCores per chip
    if vmem is None:
        vmem = 64 * 1024 * 1024 if num_tc == 2 else 128 * 1024 * 1024
    return vmem, num_tc


_VMEM_PHYS, _NUM_TC = _tpu_hw()
if _VMEM_PHYS >= 100 * 1024 * 1024:                 # v5e / v6e: 128 MiB VMEM
    _VMEM_LIMIT = 96 * 1024 * 1024
    _TM_CAP = 1024
else:                                               # v7x: 64 MiB per TensorCore
    _VMEM_LIMIT = 44 * 1024 * 1024
    _TM_CAP = 512


def _choose_m_tile(M):
    """Minimal tile count at the cap, then the smallest 16-aligned tm that covers M.
    On v7x, force >= 2 (even) tiles so both TensorCores get work."""
    m_tiles = max(1, _cdiv(M, _TM_CAP))
    if _NUM_TC >= 2 and M >= 512:
        m_tiles = max(m_tiles, 2)
        if m_tiles % 2:
            m_tiles += 1
    tm = _round_up(_cdiv(M, m_tiles), 16)           # 16: bf16 sublane packing
    return tm, tm * m_tiles, m_tiles


def _choose_k_tile(K):
    """Always lane-align K; minimal tile count at TK_CAP, minimal pad."""
    Kp0 = _round_up(K, LANE)
    k_tiles = max(1, _cdiv(Kp0, TK_CAP))
    tk = _round_up(_cdiv(Kp0, k_tiles), LANE)
    return tk, tk * k_tiles, k_tiles


# ----------------------------- Pallas kernel -------------------------------
def _fused_matmul_kernel(*refs, relu, has_residual):
    # refs: x (tm, tk) bf16 | w (tk, Cp) bf16 | bias (1, Cp) f32 | [res (tm, Cp) bf16]
    #       | out (tm, Cp) bf16 | acc scratch (tm, Cp) f32
    if has_residual:
        x_ref, w_ref, bias_ref, res_ref, out_ref, acc_ref = refs
    else:
        x_ref, w_ref, bias_ref, out_ref, acc_ref = refs
        res_ref = None

    k = pl.program_id(1)

    @pl.when(k == 0)
    def _init():
        acc_ref[...] = jnp.zeros_like(acc_ref)

    # bf16 x bf16 -> f32 accumulation on the MXU
    acc_ref[...] += jnp.dot(x_ref[...], w_ref[...],
                            preferred_element_type=jnp.float32)

    @pl.when(k == pl.num_programs(1) - 1)
    def _finalize():
        acc = acc_ref[...] + bias_ref[...]
        if res_ref is not None:
            acc = acc + res_ref[...].astype(jnp.float32)
        if relu:
            acc = jnp.maximum(acc, 0.0)
        out_ref[...] = acc.astype(out_ref.dtype)


def fused_matmul_bias_act(patches, w_mat, bias, residual=None, *, relu):
    """patches: (M, K) bf16; w_mat: (K, Cp) bf16 (BN scale folded, Cp % 128 == 0);
    bias: (Cp,) f32; residual: None or (M, Cp) bf16. Returns (M, Cp) bf16."""
    M, K = patches.shape
    Kw, Cp = w_mat.shape
    assert Kw == K and Cp % LANE == 0

    tm, Mp, m_tiles = _choose_m_tile(M)
    tk, Kp, k_tiles = _choose_k_tile(K)

    x = patches.astype(jnp.bfloat16)
    w = w_mat.astype(jnp.bfloat16)
    if Kp != K:  # zero rows/cols contribute nothing to the accumulation
        x = jnp.pad(x, ((0, 0), (0, Kp - K)))
        w = jnp.pad(w, ((0, Kp - K), (0, 0)))
    if Mp != M:  # padded rows get bias/ReLU but are sliced off below
        x = jnp.pad(x, ((0, Mp - M), (0, 0)))
        if residual is not None:
            residual = jnp.pad(residual, ((0, Mp - M), (0, 0)))

    bias2 = bias.reshape(1, Cp).astype(jnp.float32)

    in_specs = [
        pl.BlockSpec((tm, tk), lambda i, k: (i, k)),
        pl.BlockSpec((tk, Cp), lambda i, k: (k, 0)),
        pl.BlockSpec((1, Cp), lambda i, k: (0, 0)),
    ]
    args = [x, w, bias2]
    if residual is not None:
        in_specs.append(pl.BlockSpec((tm, Cp), lambda i, k: (i, 0)))
        args.append(residual.astype(jnp.bfloat16))

    kernel = functools.partial(_fused_matmul_kernel, relu=relu,
                               has_residual=residual is not None)

    out = pl.pallas_call(
        kernel,
        out_shape=jax.ShapeDtypeStruct((Mp, Cp), jnp.bfloat16),
        grid_spec=pltpu.PrefetchScalarGridSpec(
            num_scalar_prefetch=0,
            grid=(m_tiles, k_tiles),
            in_specs=in_specs,
            out_specs=pl.BlockSpec((tm, Cp), lambda i, k: (i, 0)),
            scratch_shapes=[pltpu.VMEM((tm, Cp), jnp.float32)],
        ),
        compiler_params=pltpu.CompilerParams(
            dimension_semantics=("parallel", "arbitrary"),
            vmem_limit_bytes=_VMEM_LIMIT,
        ),
    )(*args)
    return out[:M] if Mp != M else out


# ------------------------------ JAX glue ------------------------------------
def im2col(x, k, stride, padding):
    """x: (N, H, W, C) -> patches (N*Ho*Wo, k*k*C); K ordering is (kh, kw, c).
    Keeps the input dtype (bf16 on the hot path)."""
    N, H, W, C = x.shape
    xp = jnp.pad(x, ((0, 0), (padding, padding), (padding, padding), (0, 0)))
    Ho = (H + 2 * padding - k) // stride + 1
    Wo = (W + 2 * padding - k) // stride + 1
    cols = []
    for di in range(k):
        for dj in range(k):
            cols.append(xp[:, di:di + stride * Ho:stride, dj:dj + stride * Wo:stride, :])
    patches = jnp.concatenate(cols, axis=-1)
    return patches.reshape(N * Ho * Wo, k * k * C), (N, Ho, Wo)


def folded_conv_bn_weight(w_pt, bn, cin_pad, cout_pad):
    """PyTorch conv weight (Cout, Cin, kh, kw) + eval-mode BN -> bf16 matmul weight
    (kh*kw*cin_pad, cout_pad) with BN scale folded in, plus f32 bias (cout_pad,)."""
    gamma, beta, mean, var = bn
    cout, cin, kh, kw = w_pt.shape
    scale = gamma / jnp.sqrt(var + BN_EPS)
    bias = beta - mean * scale
    w = w_pt * scale[:, None, None, None]                       # fold scale (f32)
    w = jnp.pad(w, ((0, cout_pad - cout), (0, cin_pad - cin), (0, 0), (0, 0)))
    w_mat = jnp.transpose(w, (2, 3, 1, 0)).reshape(kh * kw * cin_pad, cout_pad)
    bias = jnp.pad(bias, (0, cout_pad - cout))
    return w_mat.astype(jnp.bfloat16), bias.astype(jnp.float32)


def make_bn_params(key, c):
    k1, k2, k3, k4 = jax.random.split(key, 4)
    gamma = 1.0 + 0.1 * jax.random.normal(k1, (c,), jnp.float32)
    beta = 0.1 * jax.random.normal(k2, (c,), jnp.float32)
    mean = 0.05 * jax.random.normal(k3, (c,), jnp.float32)
    var = 1.0 + 0.1 * jax.random.uniform(k4, (c,), jnp.float32)
    return gamma, beta, mean, var


def make_block_params(key, in_ch, out_ch, stride):
    keys = jax.random.split(key, 6)
    p = {
        "w1": 0.1 * jax.random.normal(keys[0], (out_ch, in_ch, 3, 3), jnp.float32),
        "bn1": make_bn_params(keys[1], out_ch),
        "w2": 0.1 * jax.random.normal(keys[2], (out_ch, out_ch, 3, 3), jnp.float32),
        "bn2": make_bn_params(keys[3], out_ch),
        "stride": stride,
    }
    if stride != 1:
        p["wskip"] = 0.1 * jax.random.normal(keys[4], (out_ch, in_ch, 1, 1), jnp.float32)
        p["bnskip"] = make_bn_params(keys[5], out_ch)
    return p


def residual_block_forward(x_nhwc, p):
    """x_nhwc: (N, H, W, C_carried) bf16, C_carried a multiple of 128 with exact zeros
    in padded channels. Returns (N, Ho, Wo, Cp_out) bf16, Cp_out a multiple of 128."""
    stride = p["stride"]
    out_ch, in_ch = p["w1"].shape[0], p["w1"].shape[1]
    cin_carried = x_nhwc.shape[-1]
    assert cin_carried >= in_ch and cin_carried % LANE == 0
    cp_out = _round_up(out_ch, LANE)

    # conv1 (3x3, stride, pad 1) -> BN -> ReLU        (no residual stream)
    w1, b1 = folded_conv_bn_weight(p["w1"], p["bn1"], cin_carried, cp_out)
    patches1, (N, Ho, Wo) = im2col(x_nhwc, 3, stride, 1)
    h = fused_matmul_bias_act(patches1, w1, b1, relu=True)        # (M, cp_out) bf16

    # skip branch
    if stride != 1:
        ws, bs = folded_conv_bn_weight(p["wskip"], p["bnskip"], cin_carried, cp_out)
        patches_s, _ = im2col(x_nhwc, 1, stride, 0)
        skip = fused_matmul_bias_act(patches_s, ws, bs, relu=False)
    else:
        # identity skip: PyTorch semantics require Cin == Cout here, and the carried
        # tensor is already lane-padded to cp_out with exact zeros (no extra copy).
        assert in_ch == out_ch, "identity skip requires in_ch == out_ch"
        assert cin_carried == cp_out
        skip = x_nhwc.reshape(-1, cin_carried)

    # conv2 (3x3, stride 1, pad 1) -> BN -> (+ skip) -> ReLU   (fused residual add)
    w2, b2 = folded_conv_bn_weight(p["w2"], p["bn2"], cp_out, cp_out)
    patches2, _ = im2col(h.reshape(N, Ho, Wo, cp_out), 3, 1, 1)
    out = fused_matmul_bias_act(patches2, w2, b2, residual=skip, relu=True)
    return out.reshape(N, Ho, Wo, cp_out)


def residual_layer_forward(x_nchw, params):
    """Public entry: x in NCHW (PyTorch convention). Internals run bf16 / lane-padded."""
    x = jnp.transpose(x_nchw, (0, 2, 3, 1)).astype(jnp.bfloat16)  # -> NHWC, bf16
    c_in = x.shape[-1]
    cp_in = _round_up(c_in, LANE)
    if cp_in != c_in:                                  # lane-pad once at layer entry
        x = jnp.pad(x, ((0, 0), (0, 0), (0, 0), (0, cp_in - c_in)))
    for p in params:
        x = residual_block_forward(x, p)
    out_ch = params[-1]["w1"].shape[0]
    x = x[..., :out_ch].astype(jnp.float32)            # drop lane-padding channels
    return jnp.transpose(x, (0, 3, 1, 2))              # -> NCHW


def make_residual_layer_params(key, in_ch, out_ch, num_blocks, stride):
    keys = jax.random.split(key, num_blocks)
    params = [make_block_params(keys[0], in_ch, out_ch, stride)]
    for i in range(1, num_blocks):
        params.append(make_block_params(keys[i], out_ch, out_ch, 1))
    return params


# ----------------------- pure-JAX reference (f32) ----------------------------
def _reference_forward(x_nchw, params):
    def conv(h, w_pt, s, pad):
        w = jnp.transpose(w_pt, (2, 3, 1, 0))          # HWIO
        return jax.lax.conv_general_dilated(
            h, w, window_strides=(s, s), padding=[(pad, pad), (pad, pad)],
            dimension_numbers=("NHWC", "HWIO", "NHWC"))

    def bn(h, bnp):
        gamma, beta, mean, var = bnp
        scale = gamma / jnp.sqrt(var + BN_EPS)
        return h * scale + (beta - mean * scale)

    x = jnp.transpose(x_nchw, (0, 2, 3, 1))
    for p in params:
        stride = p["stride"]
        h = jnp.maximum(bn(conv(x, p["w1"], stride, 1), p["bn1"]), 0.0)
        h = bn(conv(h, p["w2"], 1, 1), p["bn2"])
        skip = bn(conv(x, p["wskip"], stride, 0), p["bnskip"]) if stride != 1 else x
        x = jnp.maximum(h + skip, 0.0)
    return jnp.transpose(x, (0, 3, 1, 2))


# -------------------------------- main ---------------------------------------
if __name__ == "__main__":
    key = jax.random.PRNGKey(0)
    k_x, k_p = jax.random.split(key)

    # small shapes: batch=2, in_ch=4, out_ch=8, spatial=16, num_blocks=2, stride=2
    N, C_IN, C_OUT, H, W = 2, 4, 8, 16, 16
    NUM_BLOCKS, STRIDE = 2, 2

    x = jax.random.normal(k_x, (N, C_IN, H, W), jnp.float32)      # NCHW like PyTorch
    params = make_residual_layer_params(k_p, C_IN, C_OUT, NUM_BLOCKS, STRIDE)

    fwd = jax.jit(lambda inp: residual_layer_forward(inp, params))
    out = jax.block_until_ready(fwd(x))

    assert out.shape == (N, C_OUT, H // STRIDE, W // STRIDE), out.shape
    assert bool(jnp.all(jnp.isfinite(out))) and bool(jnp.all(out >= 0.0))

    ref = _reference_forward(x, params)
    assert bool(jnp.allclose(out, ref, atol=7.5e-2, rtol=7.5e-2)), (
        float(jnp.max(jnp.abs(out - ref))))

    print("KERNEL_OK")
</pallas_src>

<mosaic_0001>
module attributes {stable_mosaic.version = 11 : i64} {
  func.func @_fused_matmul_kernel(%arg0: i32, %arg1: i32, %arg2: memref<128x128xbf16, #tpu.memory_space<vmem>>, %arg3: memref<128x128xbf16, #tpu.memory_space<vmem>>, %arg4: memref<1x128xf32, #tpu.memory_space<vmem>>, %arg5: memref<128x128xbf16, #tpu.memory_space<vmem>>, %arg6: memref<128x128xf32, #tpu.memory_space<vmem>>) attributes {dimension_semantics = [#tpu.dimension_semantics<parallel>, #tpu.dimension_semantics<arbitrary>], iteration_bounds = array<i64: 1, 1>, scalar_prefetch = 0 : i64, scratch_operands = 1 : i64, tpu.core_type = #tpu.core_type<tc>, window_params = [{transform_indices = @transform_0, window_bounds = array<i64: 128, 128>}, {transform_indices = @transform_1, window_bounds = array<i64: 128, 128>}, {pipeline_mode = #tpu.pipeline_mode<synchronous>, transform_indices = @transform_2, window_bounds = array<i64: 1, 128>}, {transform_indices = @transform_3, window_bounds = array<i64: 128, 128>}]} {
    %c0_i32 = arith.constant 0 : i32
    %0 = arith.cmpi eq, %arg1, %c0_i32 : i32
    %1 = arith.extui %0 : i1 to i32
    %c0_i32_0 = arith.constant 0 : i32
    %2 = arith.cmpi ne, %1, %c0_i32_0 : i32
    scf.if %2 {
      %cst_10 = arith.constant 0.000000e+00 : f32
      %12 = vector.broadcast %cst_10 : f32 to vector<128x128xf32>
      %c0_11 = arith.constant 0 : index
      %c0_12 = arith.constant 0 : index
      %13 = vector.load %arg6[%c0_11, %c0_12] : memref<128x128xf32, #tpu.memory_space<vmem>>, vector<128x128xf32>
      tpu.vector_store %arg6[%c0_11, %c0_12], %12 {strides = array<i32>} : memref<128x128xf32, #tpu.memory_space<vmem>>, vector<128x128xf32>,
    } else {
    }
    %c0 = arith.constant 0 : index
    %c0_1 = arith.constant 0 : index
    %3 = vector.load %arg6[%c0, %c0_1] : memref<128x128xf32, #tpu.memory_space<vmem>>, vector<128x128xf32>
    %c0_2 = arith.constant 0 : index
    %c0_3 = arith.constant 0 : index
    %4 = vector.load %arg2[%c0_2, %c0_3] : memref<128x128xbf16, #tpu.memory_space<vmem>>, vector<128x128xbf16>
    %c0_4 = arith.constant 0 : index
    %c0_5 = arith.constant 0 : index
    %5 = vector.load %arg3[%c0_4, %c0_5] : memref<128x128xbf16, #tpu.memory_space<vmem>>, vector<128x128xbf16>
    %cst = arith.constant dense<0.000000e+00> : vector<128x128xf32>
    %6 = tpu.matmul %4, %5, %cst {dimension_numbers = #tpu.dot_dimension_numbers<[1], [0], [0], [1], [0, 0, 1, 1], [], []>} : vector<128x128xbf16>, vector<128x128xbf16>, vector<128x128xf32> -> vector<128x128xf32>
    %7 = arith.addf %3, %6 : vector<128x128xf32>
    %c0_6 = arith.constant 0 : index
    %c0_7 = arith.constant 0 : index
    %8 = vector.load %arg6[%c0_6, %c0_7] : memref<128x128xf32, #tpu.memory_space<vmem>>, vector<128x128xf32>
    tpu.vector_store %arg6[%c0_6, %c0_7], %7 {strides = array<i32>} : memref<128x128xf32, #tpu.memory_space<vmem>>, vector<128x128xf32>,
    %c0_i32_8 = arith.constant 0 : i32
    %9 = arith.cmpi eq, %arg1, %c0_i32_8 : i32
    %10 = arith.extui %9 : i1 to i32
    %c0_i32_9 = arith.constant 0 : i32
    %11 = arith.cmpi ne, %10, %c0_i32_9 : i32
    scf.if %11 {
      %c0_10 = arith.constant 0 : index
      %c0_11 = arith.constant 0 : index
      %12 = vector.load %arg6[%c0_10, %c0_11] : memref<128x128xf32, #tpu.memory_space<vmem>>, vector<128x128xf32>
      %c0_12 = arith.constant 0 : index
      %c0_13 = arith.constant 0 : index
      %13 = vector.load %arg4[%c0_12, %c0_13] : memref<1x128xf32, #tpu.memory_space<vmem>>, vector<1x128xf32>
      %14 = vector.broadcast %13 : vector<1x128xf32> to vector<128x128xf32>
      %15 = arith.addf %12, %14 : vector<128x128xf32>
      %16 = arith.truncf %15 : vector<128x128xf32> to vector<128x128xbf16>
      %c0_14 = arith.constant 0 : index
      %c0_15 = arith.constant 0 : index
      %17 = vector.load %arg5[%c0_14, %c0_15] : memref<128x128xbf16, #tpu.memory_space<vmem>>, vector<128x128xbf16>
      tpu.vector_store %arg5[%c0_14, %c0_15], %16 {strides = array<i32>} : memref<128x128xbf16, #tpu.memory_space<vmem>>, vector<128x128xbf16>,
    } else {
    }
    return
  }
  func.func @transform_0(%arg0: i32, %arg1: i32) -> (i32, i32) {
    %c0_i32 = arith.constant 0 : i32
    return %arg0, %arg1 : i32, i32
  }
  func.func @transform_1(%arg0: i32, %arg1: i32) -> (i32, i32) {
    %c0_i32 = arith.constant 0 : i32
    %c0_i32_0 = arith.constant 0 : i32
    return %arg1, %c0_i32 : i32, i32
  }
  func.func @transform_2(%arg0: i32, %arg1: i32) -> (i32, i32) {
    %c0_i32 = arith.constant 0 : i32
    %c0_i32_0 = arith.constant 0 : i32
    %c0_i32_1 = arith.constant 0 : i32
    return %c0_i32, %c0_i32_0 : i32, i32
  }
  func.func @transform_3(%arg0: i32, %arg1: i32) -> (i32, i32) {
    %c0_i32 = arith.constant 0 : i32
    %c0_i32_0 = arith.constant 0 : i32
    return %arg0, %c0_i32 : i32, i32
  }
}

module attributes {stable_mosaic.version = 11 : i64} {
  func.func @_fused_matmul_kernel(%arg0: i32, %arg1: i32, %arg2: memref<128x640xbf16, #tpu.memory_space<vmem>>, %arg3: memref<640x128xbf16, #tpu.memory_space<vmem>>, %arg4: memref<1x128xf32, #tpu.memory_space<vmem>>, %arg5: memref<128x128xbf16, #tpu.memory_space<vmem>>, %arg6: memref<128x128xf32, #tpu.memory_space<vmem>>) attributes {dimension_semantics = [#tpu.dimension_semantics<parallel>, #tpu.dimension_semantics<arbitrary>], iteration_bounds = array<i64: 1, 2>, scalar_prefetch = 0 : i64, scratch_operands = 1 : i64, tpu.core_type = #tpu.core_type<tc>, window_params = [{transform_indices = @transform_0, window_bounds = array<i64: 128, 640>}, {transform_indices = @transform_1, window_bounds = array<i64: 640, 128>}, {pipeline_mode = #tpu.pipeline_mode<synchronous>, transform_indices = @transform_2, window_bounds = array<i64: 1, 128>}, {transform_indices = @transform_3, window_bounds = array<i64: 128, 128>}]} {
    %c0_i32 = arith.constant 0 : i32
    %0 = arith.cmpi eq, %arg1, %c0_i32 : i32
    %1 = arith.extui %0 : i1 to i32
    %c0_i32_0 = arith.constant 0 : i32
    %2 = arith.cmpi ne, %1, %c0_i32_0 : i32
    scf.if %2 {
      %cst_9 = arith.constant 0.000000e+00 : f32
      %12 = vector.broadcast %cst_9 : f32 to vector<128x128xf32>
      %c0_10 = arith.constant 0 : index
      %c0_11 = arith.constant 0 : index
      %13 = vector.load %arg6[%c0_10, %c0_11] : memref<128x128xf32, #tpu.memory_space<vmem>>, vector<128x128xf32>
      tpu.vector_store %arg6[%c0_10, %c0_11], %12 {strides = array<i32>} : memref<128x128xf32, #tpu.memory_space<vmem>>, vector<128x128xf32>,
    } else {
    }
    %c0 = arith.constant 0 : index
    %c0_1 = arith.constant 0 : index
    %3 = vector.load %arg6[%c0, %c0_1] : memref<128x128xf32, #tpu.memory_space<vmem>>, vector<128x128xf32>
    %c0_2 = arith.constant 0 : index
    %c0_3 = arith.constant 0 : index
    %4 = vector.load %arg2[%c0_2, %c0_3] : memref<128x640xbf16, #tpu.memory_space<vmem>>, vector<128x640xbf16>
    %c0_4 = arith.constant 0 : index
    %c0_5 = arith.constant 0 : index
    %5 = vector.load %arg3[%c0_4, %c0_5] : memref<640x128xbf16, #tpu.memory_space<vmem>>, vector<640x128xbf16>
    %cst = arith.constant dense<0.000000e+00> : vector<128x128xf32>
    %6 = tpu.matmul %4, %5, %cst {dimension_numbers = #tpu.dot_dimension_numbers<[1], [0], [0], [1], [0, 0, 1, 1], [], []>} : vector<128x640xbf16>, vector<640x128xbf16>, vector<128x128xf32> -> vector<128x128xf32>
    %7 = arith.addf %3, %6 : vector<128x128xf32>
    %c0_6 = arith.constant 0 : index
    %c0_7 = arith.constant 0 : index
    %8 = vector.load %arg6[%c0_6, %c0_7] : memref<128x128xf32, #tpu.memory_space<vmem>>, vector<128x128xf32>
    tpu.vector_store %arg6[%c0_6, %c0_7], %7 {strides = array<i32>} : memref<128x128xf32, #tpu.memory_space<vmem>>, vector<128x128xf32>,
    %c1_i32 = arith.constant 1 : i32
    %9 = arith.cmpi eq, %arg1, %c1_i32 : i32
    %10 = arith.extui %9 : i1 to i32
    %c0_i32_8 = arith.constant 0 : i32
    %11 = arith.cmpi ne, %10, %c0_i32_8 : i32
    scf.if %11 {
      %c0_9 = arith.constant 0 : index
      %c0_10 = arith.constant 0 : index
      %12 = vector.load %arg6[%c0_9, %c0_10] : memref<128x128xf32, #tpu.memory_space<vmem>>, vector<128x128xf32>
      %c0_11 = arith.constant 0 : index
      %c0_12 = arith.constant 0 : index
      %13 = vector.load %arg4[%c0_11, %c0_12] : memref<1x128xf32, #tpu.memory_space<vmem>>, vector<1x128xf32>
      %14 = vector.broadcast %13 : vector<1x128xf32> to vector<128x128xf32>
      %15 = arith.addf %12, %14 : vector<128x128xf32>
      %cst_13 = arith.constant 0.000000e+00 : f32
      %16 = vector.broadcast %cst_13 : f32 to vector<128x128xf32>
      %17 = arith.maximumf %15, %16 : vector<128x128xf32>
      %18 = arith.truncf %17 : vector<128x128xf32> to vector<128x128xbf16>
      %c0_14 = arith.constant 0 : index
      %c0_15 = arith.constant 0 : index
      %19 = vector.load %arg5[%c0_14, %c0_15] : memref<128x128xbf16, #tpu.memory_space<vmem>>, vector<128x128xbf16>
      tpu.vector_store %arg5[%c0_14, %c0_15], %18 {strides = array<i32>} : memref<128x128xbf16, #tpu.memory_space<vmem>>, vector<128x128xbf16>,
    } else {
    }
    return
  }
  func.func @transform_0(%arg0: i32, %arg1: i32) -> (i32, i32) {
    %c0_i32 = arith.constant 0 : i32
    return %arg0, %arg1 : i32, i32
  }
  func.func @transform_1(%arg0: i32, %arg1: i32) -> (i32, i32) {
    %c0_i32 = arith.constant 0 : i32
    %c0_i32_0 = arith.constant 0 : i32
    return %arg1, %c0_i32 : i32, i32
  }
  func.func @transform_2(%arg0: i32, %arg1: i32) -> (i32, i32) {
    %c0_i32 = arith.constant 0 : i32
    %c0_i32_0 = arith.constant 0 : i32
    %c0_i32_1 = arith.constant 0 : i32
    return %c0_i32, %c0_i32_0 : i32, i32
  }
  func.func @transform_3(%arg0: i32, %arg1: i32) -> (i32, i32) {
    %c0_i32 = arith.constant 0 : i32
    %c0_i32_0 = arith.constant 0 : i32
    return %arg0, %c0_i32 : i32, i32
  }
}

module attributes {stable_mosaic.version = 11 : i64} {
  func.func @_fused_matmul_kernel(%arg0: i32, %arg1: i32, %arg2: memref<128x640xbf16, #tpu.memory_space<vmem>>, %arg3: memref<640x128xbf16, #tpu.memory_space<vmem>>, %arg4: memref<1x128xf32, #tpu.memory_space<vmem>>, %arg5: memref<128x128xbf16, #tpu.memory_space<vmem>>, %arg6: memref<128x128xbf16, #tpu.memory_space<vmem>>, %arg7: memref<128x128xf32, #tpu.memory_space<vmem>>) attributes {dimension_semantics = [#tpu.dimension_semantics<parallel>, #tpu.dimension_semantics<arbitrary>], iteration_bounds = array<i64: 1, 2>, scalar_prefetch = 0 : i64, scratch_operands = 1 : i64, tpu.core_type = #tpu.core_type<tc>, window_params = [{transform_indices = @transform_0, window_bounds = array<i64: 128, 640>}, {transform_indices = @transform_1, window_bounds = array<i64: 640, 128>}, {pipeline_mode = #tpu.pipeline_mode<synchronous>, transform_indices = @transform_2, window_bounds = array<i64: 1, 128>}, {transform_indices = @transform_3, window_bounds = array<i64: 128, 128>}, {transform_indices = @transform_4, window_bounds = array<i64: 128, 128>}]} {
    %c0_i32 = arith.constant 0 : i32
    %0 = arith.cmpi eq, %arg1, %c0_i32 : i32
    %1 = arith.extui %0 : i1 to i32
    %c0_i32_0 = arith.constant 0 : i32
    %2 = arith.cmpi ne, %1, %c0_i32_0 : i32
    scf.if %2 {
      %cst_9 = arith.constant 0.000000e+00 : f32
      %12 = vector.broadcast %cst_9 : f32 to vector<128x128xf32>
      %c0_10 = arith.constant 0 : index
      %c0_11 = arith.constant 0 : index
      %13 = vector.load %arg7[%c0_10, %c0_11] : memref<128x128xf32, #tpu.memory_space<vmem>>, vector<128x128xf32>
      tpu.vector_store %arg7[%c0_10, %c0_11], %12 {strides = array<i32>} : memref<128x128xf32, #tpu.memory_space<vmem>>, vector<128x128xf32>,
    } else {
    }
    %c0 = arith.constant 0 : index
    %c0_1 = arith.constant 0 : index
    %3 = vector.load %arg7[%c0, %c0_1] : memref<128x128xf32, #tpu.memory_space<vmem>>, vector<128x128xf32>
    %c0_2 = arith.constant 0 : index
    %c0_3 = arith.constant 0 : index
    %4 = vector.load %arg2[%c0_2, %c0_3] : memref<128x640xbf16, #tpu.memory_space<vmem>>, vector<128x640xbf16>
    %c0_4 = arith.constant 0 : index
    %c0_5 = arith.constant 0 : index
    %5 = vector.load %arg3[%c0_4, %c0_5] : memref<640x128xbf16, #tpu.memory_space<vmem>>, vector<640x128xbf16>
    %cst = arith.constant dense<0.000000e+00> : vector<128x128xf32>
    %6 = tpu.matmul %4, %5, %cst {dimension_numbers = #tpu.dot_dimension_numbers<[1], [0], [0], [1], [0, 0, 1, 1], [], []>} : vector<128x640xbf16>, vector<640x128xbf16>, vector<128x128xf32> -> vector<128x128xf32>
    %7 = arith.addf %3, %6 : vector<128x128xf32>
    %c0_6 = arith.constant 0 : index
    %c0_7 = arith.constant 0 : index
    %8 = vector.load %arg7[%c0_6, %c0_7] : memref<128x128xf32, #tpu.memory_space<vmem>>, vector<128x128xf32>
    tpu.vector_store %arg7[%c0_6, %c0_7], %7 {strides = array<i32>} : memref<128x128xf32, #tpu.memory_space<vmem>>, vector<128x128xf32>,
    %c1_i32 = arith.constant 1 : i32
    %9 = arith.cmpi eq, %arg1, %c1_i32 : i32
    %10 = arith.extui %9 : i1 to i32
    %c0_i32_8 = arith.constant 0 : i32
    %11 = arith.cmpi ne, %10, %c0_i32_8 : i32
    scf.if %11 {
      %c0_9 = arith.constant 0 : index
      %c0_10 = arith.constant 0 : index
      %12 = vector.load %arg7[%c0_9, %c0_10] : memref<128x128xf32, #tpu.memory_space<vmem>>, vector<128x128xf32>
      %c0_11 = arith.constant 0 : index
      %c0_12 = arith.constant 0 : index
      %13 = vector.load %arg4[%c0_11, %c0_12] : memref<1x128xf32, #tpu.memory_space<vmem>>, vector<1x128xf32>
      %14 = vector.broadcast %13 : vector<1x128xf32> to vector<128x128xf32>
      %15 = arith.addf %12, %14 : vector<128x128xf32>
      %c0_13 = arith.constant 0 : index
      %c0_14 = arith.constant 0 : index
      %16 = vector.load %arg5[%c0_13, %c0_14] : memref<128x128xbf16, #tpu.memory_space<vmem>>, vector<128x128xbf16>
      %17 = arith.extf %16 : vector<128x128xbf16> to vector<128x128xf32>
      %18 = arith.addf %15, %17 : vector<128x128xf32>
      %cst_15 = arith.constant 0.000000e+00 : f32
      %19 = vector.broadcast %cst_15 : f32 to vector<128x128xf32>
      %20 = arith.maximumf %18, %19 : vector<128x128xf32>
      %21 = arith.truncf %20 : vector<128x128xf32> to vector<128x128xbf16>
      %c0_16 = arith.constant 0 : index
      %c0_17 = arith.constant 0 : index
      %22 = vector.load %arg6[%c0_16, %c0_17] : memref<128x128xbf16, #tpu.memory_space<vmem>>, vector<128x128xbf16>
      tpu.vector_store %arg6[%c0_16, %c0_17], %21 {strides = array<i32>} : memref<128x128xbf16, #tpu.memory_space<vmem>>, vector<128x128xbf16>,
    } else {
    }
    return
  }
  func.func @transform_0(%arg0: i32, %arg1: i32) -> (i32, i32) {
    %c0_i32 = arith.constant 0 : i32
    return %arg0, %arg1 : i32, i32
  }
  func.func @transform_1(%arg0: i32, %arg1: i32) -> (i32, i32) {
    %c0_i32 = arith.constant 0 : i32
    %c0_i32_0 = arith.constant 0 : i32
    return %arg1, %c0_i32 : i32, i32
  }
  func.func @transform_2(%arg0: i32, %arg1: i32) -> (i32, i32) {
    %c0_i32 = arith.constant 0 : i32
    %c0_i32_0 = arith.constant 0 : i32
    %c0_i32_1 = arith.constant 0 : i32
    return %c0_i32, %c0_i32_0 : i32, i32
  }
  func.func @transform_3(%arg0: i32, %arg1: i32) -> (i32, i32) {
    %c0_i32 = arith.constant 0 : i32
    %c0_i32_0 = arith.constant 0 : i32
    return %arg0, %c0_i32 : i32, i32
  }
  func.func @transform_4(%arg0: i32, %arg1: i32) -> (i32, i32) {
    %c0_i32 = arith.constant 0 : i32
    %c0_i32_0 = arith.constant 0 : i32
    return %arg0, %c0_i32 : i32, i32
  }
}

</mosaic_0001>

<bundles_post_ra>
// kernel: _lambda_.6
= control target key start
LH: loop header
LB: loop body
LE: loop exit
PB: predicated region body
PF: predicated region fallthrough
CT: control target
= control target key end

     0   :  { %8 = vsyncpa [#allocation4], 0  ;;  %s854_s0 = inlined_call_operand.hbm [shape: bf16[128,128], index: 0, kind: input, shape index: {}]   ;;  %s855_s1 = inlined_call_operand.hbm [shape: bf16[128,128], index: 1, kind: input, shape index: {}]   ;;  %s856_s2 = inlined_call_operand.hbm [shape: f32[1,128], index: 2, kind: input, shape index: {}]   ;;  %s857_s3 = inlined_call_operand.hbm [shape: bf16[128,128], index: 3, kind: output, shape index: {}]  }
   0x1   :  { %9 = vsyncpa [#allocation7], 0 }
   0x2   :  { %10 = vsyncpa [#allocation5], 0  ;;  %s764_s12 = smov [#allocation6]   ;;  %s765_s14 = smov [#allocation3]  }
   0x3   :  { %s28_s13 = sshll.u32 %s764_s12, 4  ;;  %s16_s15 = sshll.u32 %s765_s14, 4  ;;  %s29_s13 = int_to_ptr.vmem [resolvable:$true] %s28_s13  ;;  %s790_s15 = int_to_ptr.vmem [resolvable:$true] %s16_s15 }
   0x4   :  { %s670_s18 = scalar_lea.hbm %s855_s1, 1024 }
   0x5   :  { %p671_p0 = scmp.ne.s32.totalorder %s855_s1, %s670_s18  ;;  %p674_p1 = scmp.lt.u32.totalorder %s670_s18, %s855_s1 }
   0x7   :  { %p676_p2 = pnand %p674_p1, %p671_p0 }
   0x9   :  { %679 = shalt.err (!%p676_p2)
}
   0xa   :  { %s680_s23 = scalar_lea.vmem %s29_s13, 1024  ;;  %p685_p4 = scmp.lt.s32.totalorder %s29_s13, %s29_s13 }
   0xb   :  { %p681_p3 = scmp.ne.s32.totalorder %s29_s13, %s680_s23  ;;  %p686_p5 = scmp.lt.s32.totalorder %s680_s23, %s680_s23 }
   0xd   :  { %p687_p6 = por %p686_p5, %p685_p4 }
   0xf   :  { %p688_p7 = pnand %p687_p6, %p681_p3 }
  0x11   :  { %691 = shalt.err (!%p688_p7)
}
  0x12   :  { %s766_s24 = smov 64   ;;  %s767_s25 = smov 4  }
  0x13   :  { %34 = dma.hbm_to_vmem [thread:$0]  %s855_s1, 1024, %s29_s13, [#allocation7], %s766_s24, %s766_s24, %s767_s25  }
  0x14   :  { %s692_s30 = scalar_lea.hbm %s854_s0, 1024 }
  0x15   :  { %p693_p8 = scmp.ne.s32.totalorder %s854_s0, %s692_s30  ;;  %p696_p9 = scmp.lt.u32.totalorder %s692_s30, %s854_s0 }
  0x17   :  { %p698_p10 = pnand %p696_p9, %p693_p8 }
  0x19   :  { %701 = shalt.err (!%p698_p10)
}
  0x1a   :  { %s702_s8 = scalar_lea.vmem %s790_s15, 1024  ;;  %p707_p12 = scmp.lt.s32.totalorder %s790_s15, %s790_s15 }
  0x1b   :  { %p703_p11 = scmp.ne.s32.totalorder %s790_s15, %s702_s8  ;;  %p708_p13 = scmp.lt.s32.totalorder %s702_s8, %s702_s8 }
  0x1d   :  { %p709_p0 = por %p708_p13, %p707_p12 }
  0x1f   :  { %p710_p1 = pnand %p709_p0, %p703_p11 }
  0x21   :  { %713 = shalt.err (!%p710_p1)
}
  0x22   :  { %22 = dma.hbm_to_vmem [thread:$0]  %s854_s0, 1024, %s790_s15, [#allocation4], %s766_s24, %s766_s24, %s767_s25  }
  0x23   :  { %s768_s10 = smov [#allocation8]   ;;  %s714_s14 = scalar_lea.hbm %s856_s2, 16 }
  0x24   :  { %s41_s11 = sshll.u32 %s768_s10, 4  ;;  %p715_p2 = scmp.ne.s32.totalorder %s856_s2, %s714_s14  ;;  %s42_s11 = int_to_ptr.vmem [resolvable:$true] %s41_s11 }
  0x25   :  { %p718_p3 = scmp.lt.u32.totalorder %s714_s14, %s856_s2 }
  0x27   :  { %p720_p4 = pnand %p718_p3, %p715_p2 }
  0x29   :  { %723 = shalt.err (!%p720_p4)
}
  0x2a   :  { %s724_s20 = scalar_lea.vmem %s42_s11, 16  ;;  %s728_s0 = scalar_lea.vmem %s42_s11, 32 }
  0x2b   :  { %p725_p5 = scmp.ne.s32.totalorder %s42_s11, %s724_s20  ;;  %p729_p6 = scmp.lt.s32.totalorder %s42_s11, %s42_s11 }
  0x2c   :  { %p730_p7 = scmp.lt.s32.totalorder %s728_s0, %s724_s20 }
  0x2e   :  { %p731_p8 = por %p730_p7, %p729_p6 }
  0x30   :  { %p732_p9 = pnand %p731_p8, %p725_p5 }
  0x32   :  { %735 = shalt.err (!%p732_p9)
}
  0x33   :  { %44 = dma.hbm_to_vmem [thread:$0]  %s856_s2, 16, %s42_s11, [#allocation7]  }
  0x34   :  { %758 = dma.done.wait [#allocation4], 1024  }
  0x35   :  { %759 = vsyncadd [#allocation4], 4294966272 }
  0x36   :  { %760 = dma.done.wait [#allocation7], 1040  }
  0x37   :  { %761 = vsyncadd [#allocation7], 4294966256  ;;  %v654_v0 = vld [vmem:[#allocation6] sm:$0xff]   ;;  %v655_v1 = vld [vmem:[#allocation6 + $0x8] sm:$0xff]   ;;  %s769_s2 = smov [#allocation9]  }
  0x38   :  { %600 = vmatprep.subr.bf16.mxu0 %v654_v0  ;;  %632 = vmatprep.subr.bf16.mxu1 %v654_v0  ;;  %v656_v2 = vld [vmem:[#allocation6 + $0x10] sm:$0xff]   ;;  %v657_v3 = vld [vmem:[#allocation6 + $0x18] sm:$0xff]   ;;  %v662_v4 = vld [vmem:[#allocation3] sm:$0xff]   ;;  %s475_s22 = sshll.u32 %s769_s2, 4  ;;  %s476_s22 = int_to_ptr.vmem [resolvable:$true] %s475_s22 }
  0x39   :  { %601 = vmatpush3.bf16.msra.mxu0 %v654_v0  ;;  %640 = vmatpush3.bf16.msra.mxu1 %v654_v0  ;;  %v663_v5 = vld [vmem:[#allocation3 + $0x20] sm:$0xff]   ;;  %v659_v7 = vld [vmem:[#allocation6 + $0x28] sm:$0xff]   ;;  %v660_v8 = vld [vmem:[#allocation6 + $0x30] sm:$0xff]   ;;  %s736_s23 = scalar_lea.vmem %s476_s22, 1024  ;;  %p741_p11 = scmp.lt.s32.totalorder %s476_s22, %s476_s22 }
  0x3a   :  { %602 = vmatprep.subr.bf16.mxu0 %v655_v1  ;;  %633 = vmatprep.subr.bf16.mxu1 %v655_v1  ;;  %v658_v6 = vld [vmem:[#allocation6 + $0x20] sm:$0xff]   ;;  %v661_v9 = vld [vmem:[#allocation6 + $0x38] sm:$0xff]   ;;  %v664_v10 = vld [vmem:[#allocation3 + $0x8] sm:$0xff]   ;;  %p737_p10 = scmp.ne.s32.totalorder %s476_s22, %s736_s23  ;;  %p742_p12 = scmp.lt.s32.totalorder %s736_s23, %s736_s23 }
  0x3b   :  { %616 = vmatprep.mubr.bf16.mxu0 %v662_v4  ;;  %624 = vmatprep.mubr.bf16.mxu1 %v663_v5  ;;  %v665_v11 = vld [vmem:[#allocation3 + $0x28] sm:$0xff]   ;;  %v666_v12 = vld [vmem:[#allocation3 + $0x10] sm:$0xff]   ;;  %v668_v14 = vld [vmem:[#allocation3 + $0x18] sm:$0xff]  }
  0x3c   :  { %v667_v13 = vld [vmem:[#allocation3 + $0x30] sm:$0xff]   ;;  %v669_v15 = vld [vmem:[#allocation3 + $0x38] sm:$0xff]   ;;  %v504_v17 = vld [vmem:[#allocation8] ss:$0 sm:$0xff]  ;;  %p743_p13 = por %p742_p12, %p741_p11 }
  0x3d   :  { %603 = vmatpush3.bf16.msra.mxu0 %v655_v1  ;;  %641 = vmatpush3.bf16.msra.mxu1 %v655_v1 }
  0x3e   :  { %604 = vmatprep.subr.bf16.mxu0 %v656_v2  ;;  %634 = vmatprep.subr.bf16.mxu1 %v656_v2  ;;  %p744_p0 = pnand %p743_p13, %p737_p10 }
  0x41   :  { %605 = vmatpush3.bf16.msra.mxu0 %v656_v2  ;;  %642 = vmatpush3.bf16.msra.mxu1 %v656_v2 }
  0x42   :  { %606 = vmatprep.subr.bf16.mxu0 %v657_v3  ;;  %635 = vmatprep.subr.bf16.mxu1 %v657_v3 }
  0x45   :  { %607 = vmatpush3.bf16.msra.mxu0 %v657_v3  ;;  %643 = vmatpush3.bf16.msra.mxu1 %v657_v3 }
  0x46   :  { %608 = vmatprep.subr.bf16.mxu0 %v658_v6  ;;  %636 = vmatprep.subr.bf16.mxu1 %v658_v6 }
  0x49   :  { %609 = vmatpush3.bf16.msra.mxu0 %v658_v6  ;;  %644 = vmatpush3.bf16.msra.mxu1 %v658_v6 }
  0x4a   :  { %610 = vmatprep.subr.bf16.mxu0 %v659_v7  ;;  %637 = vmatprep.subr.bf16.mxu1 %v659_v7 }
  0x4d   :  { %611 = vmatpush3.bf16.msra.mxu0 %v659_v7  ;;  %645 = vmatpush3.bf16.msra.mxu1 %v659_v7 }
  0x4e   :  { %612 = vmatprep.subr.bf16.mxu0 %v660_v8  ;;  %638 = vmatprep.subr.bf16.mxu1 %v660_v8 }
  0x51   :  { %613 = vmatpush3.bf16.msra.mxu0 %v660_v8  ;;  %646 = vmatpush3.bf16.msra.mxu1 %v660_v8 }
  0x52   :  { %614 = vmatprep.subr.bf16.mxu0 %v661_v9  ;;  %639 = vmatprep.subr.bf16.mxu1 %v661_v9 }
  0x55   :  { %615 = vmatpush3.bf16.msra.mxu0 %v661_v9  ;;  %647 = vmatpush3.bf16.msra.mxu1 %v661_v9 }
  0x58   :  { %617 = vmatmul.mubr.bf16.vlgmr.msra.gmra.mrb[0].mxu0 %v664_v10  ;;  %625 = vmatmul.mubr.bf16.vlgmr.msra.gmra.mrb[0].mxu1 %v665_v11 }
  0x59   :  { %620 = vmatprep.mubr.bf16.mxu0 %v666_v12  ;;  %628 = vmatprep.mubr.bf16.mxu1 %v667_v13 }
  0x60   :  { %621 = vmatmul.mubr.bf16.gmra.mrb[4].mxu0 %v668_v14  ;;  %629 = vmatmul.mubr.bf16.gmra.mrb[4].mxu1 %v669_v15 }
 0x12b   :  { %v618_v16 = vpop.f32.mrb[0].mxu0  ;;  %v626_v18 = vpop.f32.mrb[0].mxu1 }
 0x12c   :  { %v253_v19 = vpop.f32.mrb[1].mxu0  ;;  %v285_v20 = vpop.f32.mrb[1].mxu1  ;;  %v376_v23 = vadd.f32 %v618_v16, %v504_v17  ;;  %v384_v24 = vadd.f32 %v626_v18, %v504_v17 }
 0x12d   :  { %v619_v21 = vpop.f32.mrb[2].mxu0  ;;  %v627_v22 = vpop.f32.mrb[2].mxu1  ;;  %v374_v29 = vadd.f32 %v504_v17, %v253_v19  ;;  %v382_v30 = vadd.f32 %v504_v17, %v285_v20 }
 0x12e   :  { %v377_v25 = vadd.f32 %v619_v21, %v504_v17  ;;  %v385_v26 = vadd.f32 %v627_v22, %v504_v17  ;;  %v256_v27 = vpop.f32.mrb[3].mxu0  ;;  %v288_v28 = vpop.f32.mrb[3].mxu1 }
 0x12f   :  { %v375_v31 = vadd.f32 %v504_v17, %v256_v27  ;;  %v383_v32 = vadd.f32 %v504_v17, %v288_v28 }
 0x130   :  { %v545_v33 = vpack.c.bf16 %v377_v25, %v376_v23  ;;  %v565_v34 = vpack.c.bf16 %v385_v26, %v384_v24 }
 0x131   :  { %v540_v35 = vpack.c.bf16 %v375_v31, %v374_v29  ;;  %v560_v36 = vpack.c.bf16 %v383_v32, %v382_v30 }
 0x132   :  { %577 = vst [vmem:[#allocation9 + $0x8] sm:$0xff] %v545_v33   ;;  %581 = vst [vmem:[#allocation9 + $0x28] sm:$0xff] %v565_v34  }
 0x133   :  { %541 = vst [vmem:[#allocation9] sm:$0xff] %v540_v35   ;;  %580 = vst [vmem:[#allocation9 + $0x20] sm:$0xff] %v560_v36   ;;  %v622_v37 = vpop.f32.mrb[4].mxu0  ;;  %v630_v38 = vpop.f32.mrb[4].mxu1 }
 0x134   :  { %v269_v39 = vpop.f32.mrb[5].mxu0  ;;  %v301_v40 = vpop.f32.mrb[5].mxu1  ;;  %v380_v43 = vadd.f32 %v622_v37, %v504_v17  ;;  %v388_v44 = vadd.f32 %v630_v38, %v504_v17 }
 0x135   :  { %v623_v41 = vpop.f32.mrb[6].mxu0  ;;  %v631_v42 = vpop.f32.mrb[6].mxu1  ;;  %v378_v49 = vadd.f32 %v504_v17, %v269_v39  ;;  %v386_v50 = vadd.f32 %v504_v17, %v301_v40 }
 0x136   :  { %v381_v45 = vadd.f32 %v623_v41, %v504_v17  ;;  %v389_v46 = vadd.f32 %v631_v42, %v504_v17  ;;  %v272_v47 = vpop.f32.mrb[7].mxu0  ;;  %v304_v48 = vpop.f32.mrb[7].mxu1 }
 0x137   :  { %v379_v51 = vadd.f32 %v504_v17, %v272_v47  ;;  %v387_v52 = vadd.f32 %v504_v17, %v304_v48 }
 0x138   :  { %v555_v53 = vpack.c.bf16 %v381_v45, %v380_v43  ;;  %v575_v54 = vpack.c.bf16 %v389_v46, %v388_v44 }
 0x139   :  { %v550_v55 = vpack.c.bf16 %v379_v51, %v378_v49  ;;  %v570_v56 = vpack.c.bf16 %v387_v52, %v386_v50 }
 0x13a   :  { %579 = vst [vmem:[#allocation9 + $0x18] sm:$0xff] %v555_v53   ;;  %583 = vst [vmem:[#allocation9 + $0x38] sm:$0xff] %v575_v54  }
 0x13b   :  { %578 = vst [vmem:[#allocation9 + $0x10] sm:$0xff] %v550_v55   ;;  %582 = vst [vmem:[#allocation9 + $0x30] sm:$0xff] %v570_v56  }
 0x13c   :  { %747 = shalt.err (!%p744_p0)
}
 0x13d   :  { %s748_s28 = scalar_lea.hbm %s857_s3, 1024 }
 0x13e   :  { %p749_p1 = scmp.ne.s32.totalorder %s857_s3, %s748_s28  ;;  %p752_p2 = scmp.lt.u32.totalorder %s748_s28, %s857_s3 }
 0x140   :  { %p754_p3 = pnand %p752_p2, %p749_p1 }
 0x142   :  { %757 = shalt.err (!%p754_p3)
}
 0x143   :  { %481 = dma.vmem_to_hbm [thread:$0]  %s476_s22, 1024, %s857_s3, [#allocation5], %s766_s24, %s766_s24, %s767_s25  }
 0x144   :  { %762 = dma.done.wait [#allocation5], 1024  }
 0x145   :  { %763 = vsyncadd [#allocation5], 4294966272 }
 0x146   :  { %485 = vsyncpa [#allocation4], 1 }
 0x147   :  { %486 = vsyncpa [#allocation7], 1 }
 0x148   :  { %487 = vsyncpa [#allocation5], 1 }

// kernel: _lambda_.5
= control target key start
LH: loop header
LB: loop body
LE: loop exit
PB: predicated region body
PF: predicated region fallthrough
CT: control target
= control target key end

     0   :  { %8 = vsyncpa [#allocation4], 0  ;;  %s2550_s0 = inlined_call_operand.hbm [shape: bf16[128,1280], index: 0, kind: input, shape index: {}]   ;;  %s2551_s1 = inlined_call_operand.hbm [shape: bf16[1280,128], index: 1, kind: input, shape index: {}]   ;;  %s2552_s2 = inlined_call_operand.hbm [shape: f32[1,128], index: 2, kind: input, shape index: {}]   ;;  %s2553_s3 = inlined_call_operand.hbm [shape: bf16[128,128], index: 3, kind: output, shape index: {}]  }
   0x1   :  { %10 = vsyncpa [#allocation4 + $0x1], 0 }
   0x2   :  { %11 = vsyncpa [#allocation7], 0 }
   0x3   :  { %13 = vsyncpa [#allocation7 + $0x1], 0 }
   0x4   :  { %14 = vsyncpa [#allocation5], 0  ;;  %s2201_s12 = smov 0   ;;  %s2203_s13 = smov 0  }
   0x5   :  { %s2205_s14 = smov 0   ;;  %s2207_s15 = smov 0  }
   0x6   :  { %s2209_s16 = smov 0   ;;  %s2211_s17 = smov 0  }
   0x7 LB: > { %s2230_s18 = sadd.s32 4294967295, %s2167_s17   ;;  %s41_s19 = sadd.s32 1, %s2155_s14  ;;  %s2167_s17 = sphi %s2211_s17, %s20_s17   ;;  %s2163_s16 = sphi %s2209_s16, %s2571_s16   ;;  %s2159_s15 = sphi %s2207_s15, %s2570_s15   ;;  %s2155_s14 = sphi %s2205_s14, %s2569_s14   ;;  %s2151_s13 = sphi %s2203_s13, %s2568_s13   ;;  %s2147_s12 = sphi %s2201_s12, %s2567_s12  }
   0x8   : > { %p48_p0 = scmp.ne.s32.totalorder %s2155_s14, %s2151_s13  ;;  %p49_p1 = scmp.eq.s32.totalorder %s2167_s17, 0 }
   0x9   : > { %p54_p2 = scmp.ne.s32.totalorder %s2151_s13, %s2147_s12  ;;  %p2554_p3 = scmp.eq.s32.totalorder %s2230_s18, 0 }
   0xa   : > { %p50_p4 = por %p49_p1, %p48_p0  ;;  %p1439_p5 = scmp.ge.s32.totalorder %s2167_s17, 1 }
   0xb   : > { %p2241_p6 = por %p2554_p3, %p54_p2  ;;  %p138_p7 = scmp.lt.s32.totalorder %s2167_s17, 3 }
   0xc   : > { %s2169_s22 = smov [#allocation8]   ;;  %p1833_p10 = scmp.lt.s32.totalorder %s2167_s17, 2 }
   0xd   : > { %s2558_s20 = scalar_select %p2241_p6, 1, 0 }
   0xe   : > { %p2246_p8 = pnand %p1439_p5, %p138_p7  ;;  %s151_s23 = sshll.u32 %s2169_s22, 4  ;;  %s152_s23 = int_to_ptr.vmem [resolvable:$true] %s151_s23 }
   0xf   : > { %s162_s24 = sand.u32 1, %s2155_s14   ;;  %p2260_p12 = pnand %p1833_p10, %p50_p4 }
  0x10   : > { %s2559_s21 = scalar_select %p2246_p8, 1, 0 }
  0x11   : > { %p1821_p9 = pneg %p2246_p8  ;;  %s1991_s29 = scalar_lea.hbm %s2552_s2, 16 }
  0x12   : > { %s2561_s26 = scalar_select %p2260_p12, 1, 0 }
  0x13   : > { %p2256_p11 = pnand %p1821_p9, %p2554_p3  ;;  %p1992_p13 = scmp.ne.s32.totalorder %s2552_s2, %s1991_s29 }
  0x14   : > { %p1998_p5 = scmp.lt.u32.totalorder %s1991_s29, %s2552_s2 }
  0x15   : > { %p1993_p0 = pneg %p2256_p11 }
  0x17   : > { %p1994_p1 = pnand %p1993_p0, %p1992_p13 }
  0x19   : > { %p1995_p2 = pneg %p1994_p1 }
  0x1b   : > { %p2000_p4 = pnand %p1998_p5, %p1995_p2 }
  0x1d   : > { %2003 = shalt.err (!%p2000_p4)
}
  0x1e   : > { %s2004_s7 = scalar_lea.vmem %s152_s23, 16  ;;  %s2011_s8 = scalar_lea.vmem %s152_s23, 32 }
  0x1f   : > { %p2005_p7 = scmp.ne.s32.totalorder %s152_s23, %s2004_s7  ;;  %p2012_p3 = scmp.lt.s32.totalorder %s152_s23, %s152_s23 }
  0x20   : > { %p2013_p6 = scmp.lt.s32.totalorder %s2011_s8, %s2004_s7 }
  0x21   : > { %p2007_p9 = pnand %p2005_p7, %p1993_p0 }
  0x22   : > { %p2014_p8 = por %p2013_p6, %p2012_p3 }
  0x23   : > { %p2008_p10 = pneg %p2007_p9 }
  0x25   : > { %p2015_p12 = pnand %p2014_p8, %p2008_p10 }
  0x27   : > { %2018 = shalt.err (!%p2015_p12)
}
  0x28   : > { %1824 = dma.hbm_to_vmem [thread:$0]  (!%p2256_p11), %s2552_s2, 16, %s152_s23, [#allocation7]  }
  0x29   : > { %s29_s11 = sadd.s32 1, %s2163_s16  ;;  %s2283_s12 = smul.u32 320, %s162_s24 }
  0x2a   : > { %p30_p3 = scmp.ge.s32.totalorder %s29_s11, 2  ;;  %s1549_s22 = smul.u32 320, %s2163_s16 }
  0x2b   : > { %s166_s23 = scalar_lea.vmem [#allocation3], %s2283_s12  ;;  %s186_s4 = sand.u32 1, %s2167_s17  }
  0x2c   : > { %s2573_s11 = smov (%p30_p3, %s29_s11), 0  ;;  %s2291_s28 = scalar_lea.hbm %s2550_s0, %s1549_s22 }
  0x2d   : > { %s176_s29 = sshll.u32 %s166_s23, 4  ;;  %s37_s30 = ssub.s32 %s2163_s16, %s2573_s11  ;;  %s2296_s29 = int_to_ptr.vmem [resolvable:$true] %s176_s29 }
  0x2e   : > { %p39_p6 = scmp.eq.s32.totalorder %s37_s30, 0  ;;  %s2306_s6 = scalar_lea.sflag [#allocation4], %s162_s24 }
  0x2f   : > { %s2019_s7 = scalar_lea.hbm %s2291_s28, 5120  ;;  %p2562_p11 = scmp.ne.s32.totalorder %s2561_s26, 0 }
  0x30   : > { %s2302_s5 = scalar_select %p39_p6, %s2155_s14, %s41_s19  }
  0x31   : > { %p2020_p8 = scmp.ne.s32.totalorder %s2291_s28, %s2019_s7  ;;  %p2021_p12 = pneg %p2562_p11 }
  0x32   : > { %s2024_s10 = scalar_lea.hbm %s2550_s0, 10240  ;;  %p2025_p1 = scmp.lt.u32.totalorder %s2291_s28, %s2550_s0 }
  0x33   : > { %p2022_p13 = pnand %p2021_p12, %p2020_p8  ;;  %p2026_p2 = scmp.lt.u32.totalorder %s2024_s10, %s2019_s7 }
  0x34   : > { %p2028_p4 = scmp.lt.u32.totalorder %s2019_s7, %s2291_s28 }
  0x35   : > { %p2023_p0 = pneg %p2022_p13  ;;  %p2027_p5 = por %p2026_p2, %p2025_p1 }
  0x37   : > { %p2029_p7 = por %p2028_p4, %p2027_p5 }
  0x39   : > { %p2030_p9 = pnand %p2029_p7, %p2023_p0 }
  0x3b   : > { %2033 = shalt.err (!%p2030_p9)
}
  0x3c   : > { %s2034_s19 = scalar_lea.vmem %s2296_s29, 5120  ;;  %s2170_s24 = smov [#allocation3]  }
  0x3d   : > { %p2035_p10 = scmp.ne.s32.totalorder %s2296_s29, %s2034_s19  ;;  %s2039_s27 = sshll.u32 %s2170_s24, 4  ;;  %s2040_s27 = int_to_ptr.vmem [resolvable:$false] %s2039_s27 }
  0x3e   : > { %s2041_s23 = scalar_lea.vmem %s2040_s27, 10240  ;;  %p2042_p8 = scmp.lt.s32.totalorder %s2296_s29, %s2040_s27 }
  0x3f   : > { %p2037_p3 = pnand %p2035_p10, %p2021_p12  ;;  %p2043_p13 = scmp.lt.s32.totalorder %s2041_s23, %s2034_s19 }
  0x41   : > { %p2038_p6 = pneg %p2037_p3  ;;  %p2044_p1 = por %p2043_p13, %p2042_p8 }
  0x43   : > { %p2045_p2 = pnand %p2044_p1, %p2038_p6 }
  0x45   : > { %2048 = shalt.err (!%p2045_p2)
}
  0x46   : > { %s2171_s30 = smov 640   ;;  %s2172_s7 = smov 320  }
  0x47   : > { %s2173_s8 = smov 20   ;;  %s1550_s9 = smul.u32 5120, %s2163_s16 }
  0x48   : > { %1828 = dma.hbm_to_vmem [thread:$0]  (!%p2562_p11), %s2291_s28, 5120, %s2296_s29, %s2306_s6, %s2171_s30, %s2172_s7, %s2173_s8  }
  0x49   : > { %s190_s10 = scalar_lea.vmem [#allocation6], %s2283_s12  ;;  %s2341_s24 = scalar_lea.hbm %s2551_s1, %s1550_s9 }
  0x4a   : > { %s197_s22 = sshll.u32 %s190_s10, 4  ;;  %s2345_s27 = scalar_lea.sflag [#allocation7], %s186_s4  ;;  %s2336_s22 = int_to_ptr.vmem [resolvable:$true] %s197_s22 }
  0x4b   : > { %s2049_s23 = scalar_lea.hbm %s2341_s24, 5120  ;;  %s2054_s29 = scalar_lea.hbm %s2551_s1, 10240 }
  0x4c   : > { %p2050_p0 = scmp.ne.s32.totalorder %s2341_s24, %s2049_s23  ;;  %p2055_p7 = scmp.lt.u32.totalorder %s2341_s24, %s2551_s1 }
  0x4d   : > { %p2056_p9 = scmp.lt.u32.totalorder %s2054_s29, %s2049_s23  ;;  %p2058_p3 = scmp.lt.u32.totalorder %s2049_s23, %s2341_s24 }
  0x4e   : > { %p2052_p5 = pnand %p2050_p0, %p2021_p12 }
  0x4f   : > { %p2057_p10 = por %p2056_p9, %p2055_p7 }
  0x50   : > { %p2053_p4 = pneg %p2052_p5 }
  0x51   : > { %p2059_p6 = por %p2058_p3, %p2057_p10 }
  0x53   : > { %p2060_p8 = pnand %p2059_p6, %p2053_p4 }
  0x55   : > { %2063 = shalt.err (!%p2060_p8)
}
  0x56   : > { %s2064_s4 = scalar_lea.vmem %s2336_s22, 5120  ;;  %s2174_s7 = smov [#allocation6]  }
  0x57   : > { %p2065_p13 = scmp.ne.s32.totalorder %s2336_s22, %s2064_s4  ;;  %s2069_s8 = sshll.u32 %s2174_s7, 4  ;;  %s2070_s8 = int_to_ptr.vmem [resolvable:$false] %s2069_s8 }
  0x58   : > { %s2071_s9 = scalar_lea.vmem %s2070_s8, 10240  ;;  %p2072_p0 = scmp.lt.s32.totalorder %s2336_s22, %s2070_s8 }
  0x59   : > { %p2067_p1 = pnand %p2065_p13, %p2021_p12  ;;  %p2073_p5 = scmp.lt.s32.totalorder %s2071_s9, %s2064_s4 }
  0x5b   : > { %p2068_p2 = pneg %p2067_p1  ;;  %p2074_p7 = por %p2073_p5, %p2072_p0 }
  0x5d   : > { %p2075_p9 = pnand %p2074_p7, %p2068_p2 }
  0x5f   : > { %2078 = shalt.err (!%p2075_p9)
}
  0x60   : > { %s2175_s10 = smov 64   ;;  %s2176_s25 = smov 4  }
  0x61   : > { %1831 = dma.hbm_to_vmem [thread:$0]  (!%p2562_p11), %s2341_s24, 5120, %s2336_s22, %s2345_s27, %s2175_s10, %s2175_s10, %s2176_s25  }
  0x62   : > { %p2563_p12 = scmp.ne.s32.totalorder %s2559_s21, 0 }
  0x63   : > { %s211_s19 = sand.u32 (!%p2563_p12), 1, %s2151_s13   ;;  %p2564_p4 = scmp.ne.s32.totalorder (!%p2563_p12), %s2558_s20, 0 }
  0x64   : > { %209 = sbr.rel (%p2563_p12) target bundleno = 491 (0x1eb), region = 32  ;;  %s212_s12 = scalar_lea.sflag (!%p2563_p12), [#allocation4], %s211_s19 }
  0x65   : > { %s1808_s23 = smul.u32 (!%p2563_p12), 320, %s211_s19 }
  0x67   : > { %s2374_s28 = scalar_lea.vmem (!%p2563_p12), [#allocation3], %s1808_s23 }
  0x6b   : > { %2130 = dma.done.wait (%p2564_p4), %s212_s12, 5120  }
  0x6c   : > { %2132 = vsyncadd (%p2564_p4), %s212_s12, 4294962176  ;;  %s220_s29 = sand.u32 1, %s2230_s18   ;;  %s2381_s22 = scalar_lea.vmem [#allocation6], %s1808_s23 }
  0x6d   : > { %s221_s26 = scalar_lea.sflag [#allocation7], %s220_s29 }
  0x6e   : > { %2134 = dma.done.wait (%p2564_p4), %s221_s26, 5120  }
  0x6f   : > { %2136 = vsyncadd (%p2564_p4), %s221_s26, 4294962176  ;;  %p2565_p11 = scmp.eq.s32.totalorder %s2230_s18, 0 }
  0x71   : > { %2138 = dma.done.wait (%p2565_p11), [#allocation7], 16   ;;  %p2566_p10 = pmov %p2565_p11 }
  0x72   : > { %p1446_p3 = scmp.ne.s32.totalorder %s2159_s15, 0 }
  0x73   : > { %2140 = vsyncadd (%p2566_p10), [#allocation7], 4294967280  ;;  %v2177_v0 = vmov (!%p1446_p3), 0.0  }
  0x74   : > { %259 = sbr.rel (%p1446_p3) target bundleno = 124 (0x7c), region = 48  ;;  %260 = vst [vmem:[#allocation2] sm:$0xff] (!%p1446_p3), %v2177_v0  ;;  %261 = vst [vmem:[#allocation2 + $0x8] sm:$0xff] (!%p1446_p3), %v2177_v0 }
  0x75   : > { %262 = vst [vmem:[#allocation2 + $0x10] sm:$0xff] (!%p1446_p3), %v2177_v0  ;;  %263 = vst [vmem:[#allocation2 + $0x18] sm:$0xff] (!%p1446_p3), %v2177_v0 }
  0x76   : > { %264 = vst [vmem:[#allocation2 + $0x20] sm:$0xff] (!%p1446_p3), %v2177_v0  ;;  %265 = vst [vmem:[#allocation2 + $0x28] sm:$0xff] (!%p1446_p3), %v2177_v0 }
  0x77   : > { %266 = vst [vmem:[#allocation2 + $0x30] sm:$0xff] (!%p1446_p3), %v2177_v0  ;;  %267 = vst [vmem:[#allocation2 + $0x38] sm:$0xff] (!%p1446_p3), %v2177_v0 }
  0x78   : > { %268 = vst [vmem:[#allocation2 + $0x40] sm:$0xff] (!%p1446_p3), %v2177_v0  ;;  %269 = vst [vmem:[#allocation2 + $0x48] sm:$0xff] (!%p1446_p3), %v2177_v0 }
  0x79   : > { %270 = vst [vmem:[#allocation2 + $0x50] sm:$0xff] (!%p1446_p3), %v2177_v0  ;;  %271 = vst [vmem:[#allocation2 + $0x58] sm:$0xff] (!%p1446_p3), %v2177_v0 }
  0x7a   : > { %272 = vst [vmem:[#allocation2 + $0x60] sm:$0xff] (!%p1446_p3), %v2177_v0  ;;  %273 = vst [vmem:[#allocation2 + $0x68] sm:$0xff] (!%p1446_p3), %v2177_v0 }
  0x7b   : > { %274 = vst [vmem:[#allocation2 + $0x70] sm:$0xff] %v2177_v0  ;;  %275 = vst [vmem:[#allocation2 + $0x78] sm:$0xff] %v2177_v0 }
  0x7c PF: > { %v1895_v1 = vld [vmem:[%s2381_s22 + $0x40] sm:$0xff]   ;;  %v1899_v5 = vld [vmem:[%s2381_s22 + $0x48] sm:$0xff]   ;;  %v1903_v9 = vld [vmem:[%s2381_s22 + $0x50] sm:$0xff]   ;;  %p1527_p6 = scmp.ne.s32.totalorder %s2159_s15, 1 }
  0x7d   : > { %v1896_v2 = vld [vmem:[%s2381_s22 + $0xc0] sm:$0xff]   ;;  %1614 = vmatprep.subr.bf16.mxu0 %v1895_v1  ;;  %v1900_v6 = vld [vmem:[%s2381_s22 + $0xc8] sm:$0xff]   ;;  %v1904_v10 = vld [vmem:[%s2381_s22 + $0xd0] sm:$0xff]  }
  0x7e   : > { %v1897_v3 = vld [vmem:[%s2381_s22] sm:$0xff]   ;;  %1678 = vmatprep.subr.bf16.mxu1 %v1896_v2  ;;  %v1901_v7 = vld [vmem:[%s2381_s22 + $0x8] sm:$0xff]   ;;  %v1905_v11 = vld [vmem:[%s2381_s22 + $0x10] sm:$0xff]  }
  0x7f   : > { %v1898_v4 = vld [vmem:[%s2381_s22 + $0x80] sm:$0xff]   ;;  %1615 = vmatpush3.bf16.msra.mxu0 %v1897_v3  ;;  %v1902_v8 = vld [vmem:[%s2381_s22 + $0x88] sm:$0xff]   ;;  %v1906_v12 = vld [vmem:[%s2381_s22 + $0x90] sm:$0xff]  }
  0x80   : > { %1679 = vmatpush3.bf16.msra.mxu1 %v1898_v4  ;;  %1616 = vmatprep.subr.bf16.mxu0 %v1899_v5  ;;  %v1907_v13 = vld [vmem:[%s2381_s22 + $0x58] sm:$0xff]   ;;  %v1911_v17 = vld [vmem:[%s2381_s22 + $0x60] sm:$0xff]   ;;  %v1915_v21 = vld [vmem:[%s2381_s22 + $0x68] sm:$0xff]  }
  0x81   : > { %1680 = vmatprep.subr.bf16.mxu1 %v1900_v6  ;;  %v1908_v14 = vld [vmem:[%s2381_s22 + $0xd8] sm:$0xff]   ;;  %v1912_v18 = vld [vmem:[%s2381_s22 + $0xe0] sm:$0xff]   ;;  %v1916_v22 = vld [vmem:[%s2381_s22 + $0xe8] sm:$0xff]  }
  0x82   : > { %v1909_v15 = vld [vmem:[%s2381_s22 + $0x18] sm:$0xff]   ;;  %v1913_v19 = vld [vmem:[%s2381_s22 + $0x20] sm:$0xff]   ;;  %v1917_v23 = vld [vmem:[%s2381_s22 + $0x28] sm:$0xff]  }
  0x83   : > { %1617 = vmatpush3.bf16.msra.mxu0 %v1901_v7  ;;  %v1910_v16 = vld [vmem:[%s2381_s22 + $0x98] sm:$0xff]   ;;  %v1914_v20 = vld [vmem:[%s2381_s22 + $0xa0] sm:$0xff]   ;;  %v1918_v24 = vld [vmem:[%s2381_s22 + $0xa8] sm:$0xff]  }
  0x84   : > { %1681 = vmatpush3.bf16.msra.mxu1 %v1902_v8  ;;  %1618 = vmatprep.subr.bf16.mxu0 %v1903_v9  ;;  %v1919_v25 = vld [vmem:[%s2381_s22 + $0x70] sm:$0xff]   ;;  %v1923_v29 = vld [vmem:[%s2381_s22 + $0x78] sm:$0xff]   ;;  %v1932_v36 = vld [vmem:[%s2374_s28 + $0xc] ss:$20 sps:$4 sm:$0xff]  }
  0x85   : > { %1682 = vmatprep.subr.bf16.mxu1 %v1904_v10  ;;  %v1920_v26 = vld [vmem:[%s2381_s22 + $0xf0] sm:$0xff]   ;;  %v1924_v30 = vld [vmem:[%s2381_s22 + $0xf8] sm:$0xff]   ;;  %v1933_v37 = vld [vmem:[%s2381_s22 + $0x100] sm:$0xff]   ;;  %997 = vmatprep.mubr.bf16.mxu1 %v1932_v36 }
  0x86   : > { %v1921_v27 = vld [vmem:[%s2381_s22 + $0x30] sm:$0xff]   ;;  %v1925_v31 = vld [vmem:[%s2381_s22 + $0x38] sm:$0xff]   ;;  %v1934_v38 = vld [vmem:[%s2374_s28 + $0x2c] ss:$20 sps:$4 sm:$0xff]  }
  0x87   : > { %1619 = vmatpush3.bf16.msra.mxu0 %v1905_v11  ;;  %v1922_v28 = vld [vmem:[%s2381_s22 + $0xb0] sm:$0xff]   ;;  %v1926_v32 = vld [vmem:[%s2381_s22 + $0xb8] sm:$0xff]   ;;  %v1940_v40 = vld [vmem:[%s2381_s22 + $0x108] sm:$0xff]  }
  0x88   : > { %1683 = vmatpush3.bf16.msra.mxu1 %v1906_v12  ;;  %1620 = vmatprep.subr.bf16.mxu0 %v1907_v13  ;;  %v1927_v33 = vld [vmem:[%s2374_s28] ss:$20 sps:$4 sm:$0xff]   ;;  %v1929_v34 = vld [vmem:[%s2374_s28 + $0x4] ss:$20 sps:$4 sm:$0xff]   ;;  %v1930_v35 = vld [vmem:[%s2374_s28 + $0x8] ss:$20 sps:$4 sm:$0xff]  }
  0x89   : > { %1684 = vmatprep.subr.bf16.mxu1 %v1908_v14  ;;  %900 = vmatprep.mubr.bf16.mxu0 %v1929_v34  ;;  %v1936_v39 = vld [vmem:[%s2374_s28 + $0x34] ss:$20 sps:$4 sm:$0xff]   ;;  %v1939_v42 = vld [vmem:[%s2374_s28 + $0x30] ss:$20 sps:$4 sm:$0xff]   ;;  %v1954_v46 = vld [vmem:[%s2381_s22 + $0x118] sm:$0xff]  }
  0x8a   : > { %v1938_v41 = vld [vmem:[%s2374_s28 + $0x28] ss:$20 sps:$4 sm:$0xff]   ;;  %v1947_v45 = vld [vmem:[%s2381_s22 + $0x110] sm:$0xff]   ;;  %v1946_v48 = vld [vmem:[%s2374_s28 + $0x58] ss:$20 sps:$4 sm:$0xff]  }
  0x8b   : > { %1621 = vmatpush3.bf16.msra.mxu0 %v1909_v15  ;;  %v1941_v43 = vld [vmem:[%s2374_s28 + $0x54] ss:$20 sps:$4 sm:$0xff]   ;;  %v1943_v44 = vld [vmem:[%s2374_s28 + $0x5c] ss:$20 sps:$4 sm:$0xff]   ;;  %v1950_v50 = vld [vmem:[%s2374_s28 + $0x84] ss:$20 sps:$4 sm:$0xff]  }
  0x8c   : > { %1685 = vmatpush3.bf16.msra.mxu1 %v1910_v16  ;;  %1622 = vmatprep.subr.bf16.mxu0 %v1911_v17  ;;  %v1945_v47 = vld [vmem:[%s2374_s28 + $0x50] ss:$20 sps:$4 sm:$0xff]   ;;  %v1968_v52 = vld [vmem:[%s2381_s22 + $0x128] sm:$0xff]   ;;  %v1953_v54 = vld [vmem:[%s2374_s28 + $0x80] ss:$20 sps:$4 sm:$0xff]  }
  0x8d   : > { %1686 = vmatprep.subr.bf16.mxu1 %v1912_v18  ;;  %v1948_v49 = vld [vmem:[%s2374_s28 + $0x7c] ss:$20 sps:$4 sm:$0xff]   ;;  %v1961_v51 = vld [vmem:[%s2381_s22 + $0x120] sm:$0xff]   ;;  %v1952_v53 = vld [vmem:[%s2374_s28 + $0x78] ss:$20 sps:$4 sm:$0xff]  }
  0x8e   : > { %v1955_v55 = vld [vmem:[%s2374_s28 + $0xa4] ss:$20 sps:$4 sm:$0xff]   ;;  %v1975_v56 = vld [vmem:[%s2381_s22 + $0x130] sm:$0xff]   ;;  %v1957_v57 = vld [vmem:[%s2374_s28 + $0xac] ss:$20 sps:$4 sm:$0xff]  }
  0x8f   : > { %1623 = vmatpush3.bf16.msra.mxu0 %v1913_v19  ;;  %v1982_v58 = vld [vmem:[%s2381_s22 + $0x138] sm:$0xff]   ;;  %v1959_v59 = vld [vmem:[%s2374_s28 + $0xa0] ss:$20 sps:$4 sm:$0xff]   ;;  %v1967_v0 = vld [vmem:[%s2374_s28 + $0xd0] ss:$20 sps:$4 sm:$0xff]  }
  0x90   : > { %1687 = vmatpush3.bf16.msra.mxu1 %v1914_v20  ;;  %1624 = vmatprep.subr.bf16.mxu0 %v1915_v21  ;;  %v1960_v60 = vld [vmem:[%s2374_s28 + $0xa8] ss:$20 sps:$4 sm:$0xff]   ;;  %v1962_v61 = vld [vmem:[%s2374_s28 + $0xcc] ss:$20 sps:$4 sm:$0xff]   ;;  %v1973_v3 = vld [vmem:[%s2374_s28 + $0xf0] ss:$20 sps:$4 sm:$0xff]  }
  0x91   : > { %1688 = vmatprep.subr.bf16.mxu1 %v1916_v22  ;;  %v1964_v62 = vld [vmem:[%s2374_s28 + $0xd4] ss:$20 sps:$4 sm:$0xff]   ;;  %v1971_v2 = vld [vmem:[%s2374_s28 + $0xfc] ss:$20 sps:$4 sm:$0xff]   ;;  %v1974_v4 = vld [vmem:[%s2374_s28 + $0xf8] ss:$20 sps:$4 sm:$0xff]  }
  0x92   : > { %v1966_v63 = vld [vmem:[%s2374_s28 + $0xc8] ss:$20 sps:$4 sm:$0xff]   ;;  %v1978_v6 = vld [vmem:[%s2374_s28 + $0x124] ss:$20 sps:$4 sm:$0xff]   ;;  %v1981_v8 = vld [vmem:[%s2374_s28 + $0x120] ss:$20 sps:$4 sm:$0xff]  }
  0x93   : > { %1625 = vmatpush3.bf16.msra.mxu0 %v1917_v23  ;;  %v1969_v1 = vld [vmem:[%s2374_s28 + $0xf4] ss:$20 sps:$4 sm:$0xff]   ;;  %v1976_v5 = vld [vmem:[%s2374_s28 + $0x11c] ss:$20 sps:$4 sm:$0xff]   ;;  %v1980_v7 = vld [vmem:[%s2374_s28 + $0x118] ss:$20 sps:$4 sm:$0xff]  }
  0x94   : > { %1689 = vmatpush3.bf16.msra.mxu1 %v1918_v24  ;;  %1626 = vmatprep.subr.bf16.mxu0 %v1919_v25  ;;  %v1983_v9 = vld [vmem:[%s2374_s28 + $0x10] ss:$20 sps:$4 sm:$0xff]   ;;  %v1985_v11 = vld [vmem:[%s2374_s28 + $0x38] ss:$20 sps:$4 sm:$0xff]   ;;  %v1987_v13 = vld [vmem:[%s2374_s28 + $0x60] ss:$20 sps:$4 sm:$0xff]  }
  0x95   : > { %1690 = vmatprep.subr.bf16.mxu1 %v1920_v26  ;;  %v1984_v10 = vld [vmem:[%s2374_s28 + $0xb0] ss:$20 sps:$4 sm:$0xff]   ;;  %v1986_v12 = vld [vmem:[%s2374_s28 + $0xd8] ss:$20 sps:$4 sm:$0xff]   ;;  %v1988_v14 = vld [vmem:[%s2374_s28 + $0x100] ss:$20 sps:$4 sm:$0xff]  }
  0x96   : > { %v1989_v15 = vld [vmem:[%s2374_s28 + $0x88] ss:$20 sps:$4 sm:$0xff]  }
  0x97   : > { %1627 = vmatpush3.bf16.msra.mxu0 %v1921_v27  ;;  %v1990_v16 = vld [vmem:[%s2374_s28 + $0x128] ss:$20 sps:$4 sm:$0xff]  }
  0x98   : > { %1691 = vmatpush3.bf16.msra.mxu1 %v1922_v28  ;;  %1628 = vmatprep.subr.bf16.mxu0 %v1923_v29 }
  0x99   : > { %1692 = vmatprep.subr.bf16.mxu1 %v1924_v30 }
  0x9b   : > { %1629 = vmatpush3.bf16.msra.mxu0 %v1925_v31 }
  0x9c   : > { %1693 = vmatpush3.bf16.msra.mxu1 %v1926_v32  ;;  %1758 = vmatprep.subr.bf16.mxu0 %v1933_v37 }
  0x9d   : > { %1790 = vmatprep.subr.bf16.mxu1 %v1933_v37 }
  0x9e   : > { %901 = vmatmul.mubr.bf16.vlgmr.msra.gmra.mrb[0].mxu0 %v1927_v33 }
  0x9f   : > { %998 = vmatmul.mubr.bf16.vlgmr.msra.gmra.mrb[0].mxu1 %v1930_v35  ;;  %1759 = vmatpush3.bf16.msra.mxu0 %v1933_v37 }
  0xa0   : > { %1798 = vmatpush3.bf16.msra.mxu1 %v1933_v37  ;;  %908 = vmatprep.mubr.bf16.mxu0 %v1934_v38 }
  0xa1   : > { %1005 = vmatprep.mubr.bf16.mxu1 %v1936_v39  ;;  %1760 = vmatprep.subr.bf16.mxu0 %v1940_v40 }
  0xa2   : > { %1791 = vmatprep.subr.bf16.mxu1 %v1940_v40 }
  0xa3   : > { %1761 = vmatpush3.bf16.msra.mxu0 %v1940_v40 }
  0xa4   : > { %1799 = vmatpush3.bf16.msra.mxu1 %v1940_v40  ;;  %1762 = vmatprep.subr.bf16.mxu0 %v1947_v45 }
  0xa5   : > { %1792 = vmatprep.subr.bf16.mxu1 %v1947_v45 }
  0xa6   : > { %909 = vmatmul.mubr.bf16.gmra.mrb[4].mxu0 %v1938_v41 }
  0xa7   : > { %1006 = vmatmul.mubr.bf16.gmra.mrb[4].mxu1 %v1939_v42  ;;  %916 = vmatprep.mubr.bf16.mxu0 %v1941_v43 }
  0xa8   : > { %1013 = vmatprep.mubr.bf16.mxu1 %v1943_v44  ;;  %1763 = vmatpush3.bf16.msra.mxu0 %v1947_v45 }
  0xa9   : > { %1800 = vmatpush3.bf16.msra.mxu1 %v1947_v45  ;;  %1764 = vmatprep.subr.bf16.mxu0 %v1954_v46 }
  0xaa   : > { %1793 = vmatprep.subr.bf16.mxu1 %v1954_v46 }
  0xac   : > { %1765 = vmatpush3.bf16.msra.mxu0 %v1954_v46 }
  0xad   : > { %1801 = vmatpush3.bf16.msra.mxu1 %v1954_v46  ;;  %1766 = vmatprep.subr.bf16.mxu0 %v1961_v51 }
  0xae   : > { %917 = vmatmul.mubr.bf16.gmra.mrb[8].mxu0 %v1945_v47  ;;  %1794 = vmatprep.subr.bf16.mxu1 %v1961_v51 }
  0xaf   : > { %1014 = vmatmul.mubr.bf16.gmra.mrb[8].mxu1 %v1946_v48  ;;  %924 = vmatprep.mubr.bf16.mxu0 %v1948_v49 }
  0xb0   : > { %1021 = vmatprep.mubr.bf16.mxu1 %v1950_v50  ;;  %1767 = vmatpush3.bf16.msra.mxu0 %v1961_v51 }
  0xb1   : > { %1802 = vmatpush3.bf16.msra.mxu1 %v1961_v51  ;;  %1768 = vmatprep.subr.bf16.mxu0 %v1968_v52 }
  0xb2   : > { %1795 = vmatprep.subr.bf16.mxu1 %v1968_v52 }
  0xb4   : > { %1769 = vmatpush3.bf16.msra.mxu0 %v1968_v52 }
  0xb5   : > { %1803 = vmatpush3.bf16.msra.mxu1 %v1968_v52  ;;  %1770 = vmatprep.subr.bf16.mxu0 %v1975_v56 }
  0xb6   : > { %925 = vmatmul.mubr.bf16.gmra.mrb[12].mxu0 %v1952_v53  ;;  %1796 = vmatprep.subr.bf16.mxu1 %v1975_v56 }
  0xb7   : > { %1022 = vmatmul.mubr.bf16.gmra.mrb[12].mxu1 %v1953_v54  ;;  %932 = vmatprep.mubr.bf16.mxu0 %v1955_v55 }
  0xb8   : > { %1029 = vmatprep.mubr.bf16.mxu1 %v1957_v57  ;;  %1771 = vmatpush3.bf16.msra.mxu0 %v1975_v56 }
  0xb9   : > { %1804 = vmatpush3.bf16.msra.mxu1 %v1975_v56  ;;  %1772 = vmatprep.subr.bf16.mxu0 %v1982_v58 }
  0xba   : > { %1797 = vmatprep.subr.bf16.mxu1 %v1982_v58 }
  0xbc   : > { %1773 = vmatpush3.bf16.msra.mxu0 %v1982_v58 }
  0xbd   : > { %1805 = vmatpush3.bf16.msra.mxu1 %v1982_v58 }
  0xbe   : > { %933 = vmatmul.mubr.bf16.gmra.mrb[16].mxu0 %v1959_v59 }
  0xbf   : > { %1030 = vmatmul.mubr.bf16.gmra.mrb[16].mxu1 %v1960_v60  ;;  %940 = vmatprep.mubr.bf16.mxu0 %v1962_v61 }
  0xc0   : > { %1037 = vmatprep.mubr.bf16.mxu1 %v1964_v62 }
  0xc6   : > { %941 = vmatmul.mubr.bf16.gmra.mrb[20].mxu0 %v1966_v63 }
  0xc7   : > { %1038 = vmatmul.mubr.bf16.gmra.mrb[20].mxu1 %v1967_v0  ;;  %948 = vmatprep.mubr.bf16.mxu0 %v1969_v1 }
  0xc8   : > { %1045 = vmatprep.mubr.bf16.mxu1 %v1971_v2 }
  0xce   : > { %949 = vmatmul.mubr.bf16.gmra.mrb[24].mxu0 %v1973_v3 }
  0xcf   : > { %1046 = vmatmul.mubr.bf16.gmra.mrb[24].mxu1 %v1974_v4  ;;  %956 = vmatprep.mubr.bf16.mxu0 %v1976_v5 }
  0xd0   : > { %1053 = vmatprep.mubr.bf16.mxu1 %v1978_v6 }
  0xd6   : > { %957 = vmatmul.mubr.bf16.gmra.mrb[28].mxu0 %v1980_v7 }
  0xd7   : > { %1054 = vmatmul.mubr.bf16.gmra.mrb[28].mxu1 %v1981_v8  ;;  %1774 = vmatprep.mubr.bf16.mxu0 %v1983_v9 }
  0xd8   : > { %1782 = vmatprep.mubr.bf16.mxu1 %v1984_v10 }
  0xde   : > { %1775 = vmatmul.mubr.bf16.vlgmr.msra.gmra.mrb[32].mxu0 %v1985_v11 }
  0xdf   : > { %1783 = vmatmul.mubr.bf16.vlgmr.msra.gmra.mrb[32].mxu1 %v1986_v12  ;;  %1778 = vmatprep.mubr.bf16.mxu0 %v1987_v13 }
  0xe0   : > { %1786 = vmatprep.mubr.bf16.mxu1 %v1988_v14 }
  0xe6   : > { %1779 = vmatmul.mubr.bf16.gmra.mrb[36].mxu0 %v1989_v15 }
  0xe7   : > { %1787 = vmatmul.mubr.bf16.gmra.mrb[36].mxu1 %v1990_v16 }
 0x171   : > { %v1630_v17 = vpop.f32.mrb[0].mxu0 }
 0x172   : > { %v1694_v18 = vpop.f32.mrb[0].mxu1  ;;  %v1631_v19 = vpop.f32.mrb[1].mxu0 }
 0x173   : > { %v1632_v20 = vadd.f32 %v1631_v19, %v1630_v17  ;;  %v1695_v21 = vpop.f32.mrb[1].mxu1  ;;  %v1633_v22 = vpop.f32.mrb[2].mxu0 }
 0x174   : > { %v1696_v23 = vadd.f32 %v1695_v21, %v1694_v18  ;;  %v1697_v24 = vpop.f32.mrb[2].mxu1  ;;  %v1634_v25 = vpop.f32.mrb[3].mxu0 }
 0x175   : > { %v1635_v26 = vadd.f32 %v1634_v25, %v1633_v22  ;;  %v1698_v27 = vpop.f32.mrb[3].mxu1 }
 0x176   : > { %v1699_v28 = vadd.f32 %v1698_v27, %v1697_v24  ;;  %v2472_v29 = vadd.f32 %v1696_v23, %v1632_v20 }
 0x178   : > { %v2474_v30 = vadd.f32 %v1699_v28, %v1635_v26 }
 0x179   : > { %v1636_v31 = vpop.f32.mrb[4].mxu0 }
 0x17a   : > { %v1700_v32 = vpop.f32.mrb[4].mxu1  ;;  %v1637_v33 = vpop.f32.mrb[5].mxu0 }
 0x17b   : > { %v1638_v34 = vadd.f32 %v1637_v33, %v1636_v31  ;;  %v1701_v35 = vpop.f32.mrb[5].mxu1  ;;  %v1639_v36 = vpop.f32.mrb[6].mxu0 }
 0x17c   : > { %v1702_v37 = vadd.f32 %v1701_v35, %v1700_v32  ;;  %v1703_v38 = vpop.f32.mrb[6].mxu1  ;;  %v1640_v39 = vpop.f32.mrb[7].mxu0 }
 0x17d   : > { %v1641_v40 = vadd.f32 %v1640_v39, %v1639_v36  ;;  %v1704_v41 = vpop.f32.mrb[7].mxu1 }
 0x17e   : > { %v1705_v42 = vadd.f32 %v1704_v41, %v1703_v38  ;;  %v2476_v43 = vadd.f32 %v1702_v37, %v1638_v34 }
 0x180   : > { %v2478_v44 = vadd.f32 %v1705_v42, %v1641_v40 }
 0x181   : > { %v1642_v45 = vpop.f32.mrb[8].mxu0 }
 0x182   : > { %v1706_v46 = vpop.f32.mrb[8].mxu1  ;;  %v1643_v47 = vpop.f32.mrb[9].mxu0 }
 0x183   : > { %v1644_v48 = vadd.f32 %v1643_v47, %v1642_v45  ;;  %v1707_v49 = vpop.f32.mrb[9].mxu1  ;;  %v1645_v50 = vpop.f32.mrb[10].mxu0 }
 0x184   : > { %v1708_v51 = vadd.f32 %v1707_v49, %v1706_v46  ;;  %v1709_v52 = vpop.f32.mrb[10].mxu1  ;;  %v1646_v53 = vpop.f32.mrb[11].mxu0 }
 0x185   : > { %v1647_v54 = vadd.f32 %v1646_v53, %v1645_v50  ;;  %v1710_v55 = vpop.f32.mrb[11].mxu1 }
 0x186   : > { %v1711_v56 = vadd.f32 %v1710_v55, %v1709_v52  ;;  %v2480_v57 = vadd.f32 %v1708_v51, %v1644_v48 }
 0x188   : > { %v2482_v58 = vadd.f32 %v1711_v56, %v1647_v54 }
 0x189   : > { %v1648_v59 = vpop.f32.mrb[12].mxu0 }
 0x18a   : > { %v1712_v60 = vpop.f32.mrb[12].mxu1  ;;  %v1649_v61 = vpop.f32.mrb[13].mxu0 }
 0x18b   : > { %v1650_v62 = vadd.f32 %v1649_v61, %v1648_v59  ;;  %v1713_v63 = vpop.f32.mrb[13].mxu1  ;;  %v1651_v0 = vpop.f32.mrb[14].mxu0 }
 0x18c   : > { %v1714_v1 = vadd.f32 %v1713_v63, %v1712_v60  ;;  %v1715_v2 = vpop.f32.mrb[14].mxu1  ;;  %v1652_v3 = vpop.f32.mrb[15].mxu0 }
 0x18d   : > { %v1653_v4 = vadd.f32 %v1652_v3, %v1651_v0  ;;  %v1716_v5 = vpop.f32.mrb[15].mxu1 }
 0x18e   : > { %v1717_v6 = vadd.f32 %v1716_v5, %v1715_v2  ;;  %v2484_v7 = vadd.f32 %v1714_v1, %v1650_v62 }
 0x190   : > { %v2486_v8 = vadd.f32 %v1717_v6, %v1653_v4 }
 0x191   : > { %v1654_v9 = vpop.f32.mrb[16].mxu0 }
 0x192   : > { %v1718_v10 = vpop.f32.mrb[16].mxu1  ;;  %v1655_v11 = vpop.f32.mrb[17].mxu0 }
 0x193   : > { %v1656_v12 = vadd.f32 %v1655_v11, %v1654_v9  ;;  %v1719_v13 = vpop.f32.mrb[17].mxu1  ;;  %v1657_v14 = vpop.f32.mrb[18].mxu0  ;;  %v278_v9 = vld [vmem:[#allocation2 + $0x10] sm:$0xff] }
 0x194   : > { %v1720_v15 = vadd.f32 %v1719_v13, %v1718_v10  ;;  %v1721_v16 = vpop.f32.mrb[18].mxu1  ;;  %v1658_v17 = vpop.f32.mrb[19].mxu0 }
 0x195   : > { %v1659_v18 = vadd.f32 %v1658_v17, %v1657_v14  ;;  %v1722_v19 = vpop.f32.mrb[19].mxu1  ;;  %v276_v14 = vld [vmem:[#allocation2] sm:$0xff] }
 0x196   : > { %v1723_v20 = vadd.f32 %v1722_v19, %v1721_v16  ;;  %v1032_v21 = vadd.f32 %v1720_v15, %v1656_v12  ;;  %v286_v12 = vld [vmem:[#allocation2 + $0x50] sm:$0xff] }
 0x198   : > { %v2488_v22 = vadd.f32 %v1723_v20, %v1659_v18  ;;  %v284_v18 = vld [vmem:[#allocation2 + $0x40] sm:$0xff]  ;;  %v279_v20 = vld [vmem:[#allocation2 + $0x18] sm:$0xff] }
 0x199   : > { %v1660_v23 = vpop.f32.mrb[20].mxu0 }
 0x19a   : > { %v1724_v24 = vpop.f32.mrb[20].mxu1  ;;  %v1661_v25 = vpop.f32.mrb[21].mxu0 }
 0x19b   : > { %v1662_v26 = vadd.f32 %v1661_v25, %v1660_v23  ;;  %v1725_v27 = vpop.f32.mrb[21].mxu1  ;;  %v1663_v28 = vpop.f32.mrb[22].mxu0 }
 0x19c   : > { %v1726_v31 = vadd.f32 %v1725_v27, %v1724_v24  ;;  %v1727_v32 = vpop.f32.mrb[22].mxu1  ;;  %v1664_v33 = vpop.f32.mrb[23].mxu0  ;;  %v287_v27 = vld [vmem:[#allocation2 + $0x58] sm:$0xff] }
 0x19d   : > { %v1665_v34 = vadd.f32 %v1664_v33, %v1663_v28  ;;  %v1728_v35 = vpop.f32.mrb[23].mxu1 }
 0x19e   : > { %v1729_v36 = vadd.f32 %v1728_v35, %v1727_v32  ;;  %v1040_v37 = vadd.f32 %v1726_v31, %v1662_v26  ;;  %v277_v31 = vld [vmem:[#allocation2 + $0x8] sm:$0xff] }
 0x1a0   : > { %v1043_v38 = vadd.f32 %v1729_v36, %v1665_v34  ;;  %v285_v36 = vld [vmem:[#allocation2 + $0x48] sm:$0xff] }
 0x1a1   : > { %v1666_v39 = vpop.f32.mrb[24].mxu0 }
 0x1a2   : > { %v1730_v40 = vpop.f32.mrb[24].mxu1  ;;  %v1667_v41 = vpop.f32.mrb[25].mxu0 }
 0x1a3   : > { %v1668_v42 = vadd.f32 %v1667_v41, %v1666_v39  ;;  %v1731_v45 = vpop.f32.mrb[25].mxu1  ;;  %v1669_v46 = vpop.f32.mrb[26].mxu0 }
 0x1a4   : > { %v1732_v47 = vadd.f32 %v1731_v45, %v1730_v40  ;;  %v1733_v48 = vpop.f32.mrb[26].mxu1  ;;  %v1670_v49 = vpop.f32.mrb[27].mxu0  ;;  %v290_v45 = vld [vmem:[#allocation2 + $0x70] sm:$0xff] }
 0x1a5   : > { %v1671_v50 = vadd.f32 %v1670_v49, %v1669_v46  ;;  %v1734_v51 = vpop.f32.mrb[27].mxu1 }
 0x1a6   : > { %v1735_v52 = vadd.f32 %v1734_v51, %v1733_v48  ;;  %v2490_v53 = vadd.f32 %v1732_v47, %v1668_v42  ;;  %v282_v42 = vld [vmem:[#allocation2 + $0x30] sm:$0xff]  ;;  %v280_v47 = vld [vmem:[#allocation2 + $0x20] sm:$0xff] }
 0x1a8   : > { %v2492_v54 = vadd.f32 %v1735_v52, %v1671_v50  ;;  %v288_v50 = vld [vmem:[#allocation2 + $0x60] sm:$0xff]  ;;  %v283_v52 = vld [vmem:[#allocation2 + $0x38] sm:$0xff] }
 0x1a9   : > { %v1672_v55 = vpop.f32.mrb[28].mxu0 }
 0x1aa   : > { %v1736_v56 = vpop.f32.mrb[28].mxu1  ;;  %v1673_v59 = vpop.f32.mrb[29].mxu0 }
 0x1ab   : > { %v1674_v60 = vadd.f32 %v1673_v59, %v1672_v55  ;;  %v1737_v61 = vpop.f32.mrb[29].mxu1  ;;  %v1675_v62 = vpop.f32.mrb[30].mxu0 }
 0x1ac   : > { %v1738_v63 = vadd.f32 %v1737_v61, %v1736_v56  ;;  %v1739_v0 = vpop.f32.mrb[30].mxu1  ;;  %v1676_v1 = vpop.f32.mrb[31].mxu0  ;;  %v291_v61 = vld [vmem:[#allocation2 + $0x78] sm:$0xff] }
 0x1ad   : > { %v1677_v2 = vadd.f32 %v1676_v1, %v1675_v62  ;;  %v1740_v3 = vpop.f32.mrb[31].mxu1 }
 0x1ae   : > { %v1741_v4 = vadd.f32 %v1740_v3, %v1739_v0  ;;  %v1056_v5 = vadd.f32 %v1738_v63, %v1674_v60  ;;  %v281_v63 = vld [vmem:[#allocation2 + $0x28] sm:$0xff] }
 0x1b0   : > { %v2494_v6 = vadd.f32 %v1741_v4, %v1677_v2 }
 0x1b1   : > { %v1776_v10 = vpop.f32.mrb[32].mxu0 }
 0x1b2   : > { %v1105_v11 = vadd.f32 %v1776_v10, %v2476_v43  ;;  %v1784_v13 = vpop.f32.mrb[32].mxu1  ;;  %v1096_v15 = vpop.f32.mrb[33].mxu0 }
 0x1b3   : > { %v1137_v16 = vadd.f32 %v1784_v13, %v1040_v37  ;;  %v1097_v17 = vadd.f32 %v1096_v15, %v2472_v29  ;;  %v1128_v19 = vpop.f32.mrb[33].mxu1  ;;  %v1777_v23 = vpop.f32.mrb[34].mxu0 }
 0x1b4   : > { %v1161_v24 = vadd.f32 %v1105_v11, %v278_v9  ;;  %v1129_v25 = vadd.f32 %v1128_v19, %v1032_v21  ;;  %v1108_v26 = vadd.f32 %v1777_v23, %v2478_v44  ;;  %v1785_v28 = vpop.f32.mrb[34].mxu1  ;;  %v1099_v32 = vpop.f32.mrb[35].mxu0 }
 0x1b5   : > { %v1169_v43 = vadd.f32 %v1137_v16, %v286_v12  ;;  %v1159_v33 = vadd.f32 %v1097_v17, %v276_v14  ;;  %v1140_v34 = vadd.f32 %v1785_v28, %v1043_v38  ;;  %v1100_v35 = vadd.f32 %v1099_v32, %v2474_v30  ;;  %v1131_v37 = vpop.f32.mrb[35].mxu1  ;;  %v1528_v12 = vld [vmem:[#allocation8] ss:$0 sm:$0xff] (!%p1527_p6) }
 0x1b6   : > { %1177 = vst [vmem:[#allocation2 + $0x10] sm:$0xff] %v1161_v24  ;;  %v1167_v29 = vadd.f32 %v1129_v25, %v284_v18  ;;  %v1162_v39 = vadd.f32 %v1108_v26, %v279_v20  ;;  %v1132_v40 = vadd.f32 %v1131_v37, %v2488_v22 }
 0x1b7   : > { %1185 = vst [vmem:[#allocation2 + $0x50] sm:$0xff] %v1169_v43  ;;  %1175 = vst [vmem:[#allocation2] sm:$0xff] %v1159_v33  ;;  %v1170_v21 = vadd.f32 %v1140_v34, %v287_v27  ;;  %v1160_v44 = vadd.f32 %v1100_v35, %v277_v31 }
 0x1b8   : > { %1183 = vst [vmem:[#allocation2 + $0x40] sm:$0xff] %v1167_v29  ;;  %1178 = vst [vmem:[#allocation2 + $0x18] sm:$0xff] %v1162_v39  ;;  %v1168_v41 = vadd.f32 %v1132_v40, %v285_v36 }
 0x1b9   : > { %1186 = vst [vmem:[#allocation2 + $0x58] sm:$0xff] %v1170_v21  ;;  %1176 = vst [vmem:[#allocation2 + $0x8] sm:$0xff] %v1160_v44  ;;  %v1780_v38 = vpop.f32.mrb[36].mxu0 }
 0x1ba   : > { %1184 = vst [vmem:[#allocation2 + $0x48] sm:$0xff] %v1168_v41  ;;  %v1121_v30 = vadd.f32 %v1780_v38, %v2484_v7  ;;  %v1788_v46 = vpop.f32.mrb[36].mxu1  ;;  %v1112_v48 = vpop.f32.mrb[37].mxu0 }
 0x1bb   : > { %v1153_v49 = vadd.f32 %v1788_v46, %v1056_v5  ;;  %v1113_v22 = vadd.f32 %v1112_v48, %v2480_v57  ;;  %v1144_v51 = vpop.f32.mrb[37].mxu1  ;;  %v1781_v55 = vpop.f32.mrb[38].mxu0  ;;  %v289_v57 = vld [vmem:[#allocation2 + $0x68] sm:$0xff] }
 0x1bc   : > { %v1165_v56 = vadd.f32 %v1121_v30, %v282_v42  ;;  %v1145_v59 = vadd.f32 %v1144_v51, %v2490_v53  ;;  %v1124_v60 = vadd.f32 %v1781_v55, %v2486_v8  ;;  %v1789_v62 = vpop.f32.mrb[38].mxu1  ;;  %v1115_v7 = vpop.f32.mrb[39].mxu0  ;;  %1194 = sbr.rel (%p1527_p6) target bundleno = 465 (0x1d1), region = 52 }
 0x1bd   : > { %v1173_v0 = vadd.f32 %v1153_v49, %v290_v45  ;;  %v1163_v1 = vadd.f32 %v1113_v22, %v280_v47  ;;  %v1156_v2 = vadd.f32 %v1789_v62, %v2494_v6  ;;  %v1116_v3 = vadd.f32 %v1115_v7, %v2482_v58  ;;  %v1147_v4 = vpop.f32.mrb[39].mxu1  ;;  %v1197_v15 = vld [vmem:[#allocation2 + $0x10] sm:$0xff] (!%p1527_p6) }
 0x1be   : > { %1181 = vst [vmem:[#allocation2 + $0x30] sm:$0xff] %v1165_v56  ;;  %v1171_v5 = vadd.f32 %v1145_v59, %v288_v50  ;;  %v1166_v9 = vadd.f32 %v1124_v60, %v283_v52  ;;  %v1148_v10 = vadd.f32 %v1147_v4, %v2492_v54  ;;  %v1195_v58 = vld [vmem:[#allocation2] sm:$0xff] (!%p1527_p6)  ;;  %v1220_v17 = vadd.f32 (!%p1527_p6), %v1528_v12, %v1197_v15  ;;  %v1205_v43 = vld [vmem:[#allocation2 + $0x50] sm:$0xff] (!%p1527_p6) }
 0x1bf   : > { %1189 = vst [vmem:[#allocation2 + $0x70] sm:$0xff] %v1173_v0  ;;  %1179 = vst [vmem:[#allocation2 + $0x20] sm:$0xff] %v1163_v1  ;;  %v1174_v8 = vadd.f32 %v1156_v2, %v291_v61  ;;  %v1164_v53 = vadd.f32 %v1116_v3, %v281_v63  ;;  %v1218_v13 = vadd.f32 (!%p1527_p6), %v1528_v12, %v1195_v58  ;;  %v1198_v54 = vld [vmem:[#allocation2 + $0x18] sm:$0xff] (!%p1527_p6)  ;;  %v1203_v31 = vld [vmem:[#allocation2 + $0x40] sm:$0xff] (!%p1527_p6) }
 0x1c0   : > { %1187 = vst [vmem:[#allocation2 + $0x60] sm:$0xff] %v1171_v5  ;;  %1182 = vst [vmem:[#allocation2 + $0x38] sm:$0xff] %v1166_v9  ;;  %v1172_v11 = vadd.f32 %v1148_v10, %v289_v57  ;;  %v1196_v6 = vld [vmem:[#allocation2 + $0x8] sm:$0xff] (!%p1527_p6)  ;;  %v1221_v18 = vadd.f32 (!%p1527_p6), %v1528_v12, %v1198_v54  ;;  %v1236_v33 = vmax.f32 (!%p1527_p6), %v1220_v17, 0.0  ;;  %v1206_v37 = vld [vmem:[#allocation2 + $0x58] sm:$0xff] (!%p1527_p6)  ;;  %v1226_v44 = vadd.f32 (!%p1527_p6), %v1528_v12, %v1203_v31 }
 0x1c1   : > { %1190 = vst [vmem:[#allocation2 + $0x78] sm:$0xff] %v1174_v8  ;;  %1180 = vst [vmem:[#allocation2 + $0x28] sm:$0xff] %v1164_v53  ;;  %v1219_v14 = vadd.f32 (!%p1527_p6), %v1528_v12, %v1196_v6  ;;  %v1234_v25 = vmax.f32 (!%p1527_p6), %v1218_v13, 0.0  ;;  %v1204_v32 = vld [vmem:[#allocation2 + $0x48] sm:$0xff] (!%p1527_p6)  ;;  %v1228_v45 = vadd.f32 (!%p1527_p6), %v1528_v12, %v1205_v43  ;;  %v1229_v22 = vadd.f32 (!%p1527_p6), %v1528_v12, %v1206_v37 }
 0x1c2   : > { %1188 = vst [vmem:[#allocation2 + $0x68] sm:$0xff] %v1172_v11  ;;  %v1237_v34 = vmax.f32 (!%p1527_p6), %v1221_v18, 0.0  ;;  %v1227_v30 = vadd.f32 (!%p1527_p6), %v1528_v12, %v1204_v32  ;;  %v1242_v49 = vmax.f32 (!%p1527_p6), %v1226_v44, 0.0 }
 0x1c3   : > { %v1235_v26 = vmax.f32 %v1219_v14, 0.0  ;;  %v1244_v55 = vmax.f32 %v1228_v45, 0.0  ;;  %v1245_v59 = vmax.f32 %v1229_v22, 0.0 }
 0x1c4   : > { %v1575_v42 = vpack.c.bf16 %v1237_v34, %v1236_v33  ;;  %v1243_v52 = vmax.f32 %v1227_v30, 0.0 }
 0x1c5   : > { %v1201_v23 = vld [vmem:[#allocation2 + $0x30] sm:$0xff]  ;;  %v1570_v39 = vpack.c.bf16 %v1235_v26, %v1234_v25  ;;  %v1595_v0 = vpack.c.bf16 %v1245_v59, %v1244_v55 }
 0x1c6   : > { %v1199_v16 = vld [vmem:[#allocation2 + $0x20] sm:$0xff]  ;;  %v1224_v28 = vadd.f32 %v1528_v12, %v1201_v23  ;;  %v1209_v46 = vld [vmem:[#allocation2 + $0x70] sm:$0xff]  ;;  %1607 = vst [vmem:[#allocation9 + $0x8] sm:$0xff] %v1575_v42   ;;  %v1590_v63 = vpack.c.bf16 %v1243_v52, %v1242_v49 }
 0x1c7   : > { %v1222_v20 = vadd.f32 %v1528_v12, %v1199_v16  ;;  %v1202_v24 = vld [vmem:[#allocation2 + $0x38] sm:$0xff]  ;;  %v1207_v29 = vld [vmem:[#allocation2 + $0x60] sm:$0xff]  ;;  %1571 = vst [vmem:[#allocation9] sm:$0xff] %v1570_v39   ;;  %v1232_v61 = vadd.f32 %v1528_v12, %v1209_v46  ;;  %1611 = vst [vmem:[#allocation9 + $0x28] sm:$0xff] %v1595_v0  }
 0x1c8   : > { %v1200_v19 = vld [vmem:[#allocation2 + $0x28] sm:$0xff]  ;;  %v1225_v36 = vadd.f32 %v1528_v12, %v1202_v24  ;;  %v1240_v21 = vmax.f32 %v1224_v28, 0.0  ;;  %v1210_v47 = vld [vmem:[#allocation2 + $0x78] sm:$0xff]  ;;  %v1230_v50 = vadd.f32 %v1528_v12, %v1207_v29  ;;  %1610 = vst [vmem:[#allocation9 + $0x20] sm:$0xff] %v1590_v63  }
 0x1c9   : > { %v1223_v27 = vadd.f32 %v1528_v12, %v1200_v19  ;;  %v1238_v35 = vmax.f32 %v1222_v20, 0.0  ;;  %v1208_v41 = vld [vmem:[#allocation2 + $0x68] sm:$0xff]  ;;  %v1233_v62 = vadd.f32 %v1528_v12, %v1210_v47  ;;  %v1248_v1 = vmax.f32 %v1232_v61, 0.0 }
 0x1ca   : > { %v1241_v38 = vmax.f32 %v1225_v36, 0.0  ;;  %v1231_v56 = vadd.f32 %v1528_v12, %v1208_v41  ;;  %v1246_v60 = vmax.f32 %v1230_v50, 0.0 }
 0x1cb   : > { %v1239_v40 = vmax.f32 %v1223_v27, 0.0  ;;  %v1249_v2 = vmax.f32 %v1233_v62, 0.0 }
 0x1cc   : > { %v1585_v51 = vpack.c.bf16 %v1241_v38, %v1240_v21  ;;  %v1247_v7 = vmax.f32 %v1231_v56, 0.0 }
 0x1cd   : > { %v1580_v48 = vpack.c.bf16 %v1239_v40, %v1238_v35  ;;  %v1605_v57 = vpack.c.bf16 %v1249_v2, %v1248_v1 }
 0x1ce   : > { %1609 = vst [vmem:[#allocation9 + $0x18] sm:$0xff] %v1585_v51   ;;  %v1600_v3 = vpack.c.bf16 %v1247_v7, %v1246_v60 }
 0x1cf   : > { %1608 = vst [vmem:[#allocation9 + $0x10] sm:$0xff] %v1580_v48   ;;  %1613 = vst [vmem:[#allocation9 + $0x38] sm:$0xff] %v1605_v57  }
 0x1d0   : > { %1612 = vst [vmem:[#allocation9 + $0x30] sm:$0xff] %v1600_v3  }
 0x1d1 PF: > { %p1835_p8 = scmp.eq.s32.totalorder %s2230_s18, 1  ;;  %s2178_s15 = smov [#allocation9]  }
 0x1d2   : > { %s1339_s20 = sshll.u32 %s2178_s15, 4  ;;  %s1340_s20 = int_to_ptr.vmem [resolvable:$true] %s1339_s20 }
 0x1d3   : > { %s2079_s21 = scalar_lea.vmem %s1340_s20, 1024  ;;  %p2086_p0 = scmp.lt.s32.totalorder %s1340_s20, %s1340_s20 }
 0x1d4   : > { %p2080_p13 = scmp.ne.s32.totalorder %s1340_s20, %s2079_s21  ;;  %p2087_p5 = scmp.lt.s32.totalorder %s2079_s21, %s2079_s21 }
 0x1d6   : > { %p2081_p1 = pnand %p2080_p13, %p1835_p8  ;;  %p2088_p7 = por %p2087_p5, %p2086_p0 }
 0x1d8   : > { %p2082_p2 = pneg %p2081_p1 }
 0x1da   : > { %p2089_p9 = pnand %p2088_p7, %p2082_p2 }
 0x1dc   : > { %2092 = shalt.err (!%p2089_p9)
}
 0x1dd   : > { %s2093_s6 = scalar_lea.hbm %s2553_s3, 1024 }
 0x1de   : > { %p2094_p12 = scmp.ne.s32.totalorder %s2553_s3, %s2093_s6  ;;  %p2099_p10 = scmp.lt.u32.totalorder %s2093_s6, %s2553_s3 }
 0x1e0   : > { %p2095_p4 = pnand %p2094_p12, %p1835_p8 }
 0x1e2   : > { %p2096_p11 = pneg %p2095_p4 }
 0x1e4   : > { %p2101_p3 = pnand %p2099_p10, %p2096_p11 }
 0x1e6   : > { %2104 = shalt.err (!%p2101_p3)
}
 0x1e7   : > { %s2179_s9 = smov 64   ;;  %s2180_s10 = smov 4  }
 0x1e8   : > { %1818 = dma.vmem_to_hbm [thread:$0]  (%p1835_p8), %s1340_s20, 1024, %s2553_s3, [#allocation5], %s2179_s9, %s2179_s9, %s2180_s10  }
 0x1e9   : > { %2142 = dma.done.wait (%p1835_p8), [#allocation5], 1024  }
 0x1ea   : > { %2144 = vsyncadd (%p1835_p8), [#allocation5], 4294966272 }
 0x1eb PF: > { %s20_s17 = sadd.s32 1, %s2167_s17   ;;  %s2567_s12 = smov %s2151_s13 }
 0x1ec   : > { %p17_p6 = scmp.ge.s32.totalorder %s20_s17, 4   ;;  %s2568_s13 = smov %s2155_s14 }
 0x1ed   : > { %s2569_s14 = smov %s2302_s5  ;;  %s2570_s15 = smov %s2163_s16 }
 0x1ee   : > { %s2571_s16 = smov %s2573_s11  ;;  %19 = sbr.rel (!%p17_p6) target bundleno = 7 (0x7), region = 95 }
 0x1f5   :  { %1355 = vsyncpa [#allocation4], 1 }
 0x1f6   :  { %1357 = vsyncpa [#allocation4 + $0x1], 1 }
 0x1f7   :  { %1358 = vsyncpa [#allocation7], 1 }
 0x1f8   :  { %1360 = vsyncpa [#allocation7 + $0x1], 1 }
 0x1f9   :  { %1361 = vsyncpa [#allocation5], 1 }
 0x1fa   :  { %1363 = vsyncpa [#allocation5 + $0x1], 1 }

// kernel: _lambda_.7
= control target key start
LH: loop header
LB: loop body
LE: loop exit
PB: predicated region body
PF: predicated region fallthrough
CT: control target
= control target key end

     0   :  { %s2798_s0 = inlined_call_operand.hbm [shape: bf16[128,1280], index: 0, kind: input, shape index: {}]   ;;  %s2799_s1 = inlined_call_operand.hbm [shape: bf16[1280,128], index: 1, kind: input, shape index: {}]   ;;  %s2800_s2 = inlined_call_operand.hbm [shape: f32[1,128], index: 2, kind: input, shape index: {}]   ;;  %s2801_s3 = inlined_call_operand.hbm [shape: bf16[128,128], index: 3, kind: input, shape index: {}]   ;;  %s2802_s4 = inlined_call_operand.hbm [shape: bf16[128,128], index: 4, kind: output, shape index: {}]  }
   0x1   :  { %2809 = sst [smem:[#allocation17_spill]] %s2798_s0 }
   0x2   :  { %9 = vsyncpa [#allocation4], 0 }
   0x3   :  { %11 = vsyncpa [#allocation4 + $0x1], 0 }
   0x4   :  { %12 = vsyncpa [#allocation7], 0 }
   0x5   :  { %14 = vsyncpa [#allocation7 + $0x1], 0 }
   0x6   :  { %15 = vsyncpa [#allocation10], 0 }
   0x7   :  { %16 = vsyncpa [#allocation5], 0  ;;  %s2401_s15 = smov 0   ;;  %s2403_s16 = smov 0  }
   0x8   :  { %s2405_s17 = smov 0   ;;  %s2407_s18 = smov 0  }
   0x9   :  { %s2409_s19 = smov 0   ;;  %s2411_s20 = smov 0  }
   0xa LB: > { %s2430_s21 = sadd.s32 4294967295, %s2361_s20   ;;  %s43_s22 = sadd.s32 1, %s2349_s17  ;;  %s2361_s20 = sphi %s2411_s20, %s22_s20   ;;  %s2357_s19 = sphi %s2409_s19, %s2829_s19   ;;  %s2353_s18 = sphi %s2407_s18, %s2828_s18   ;;  %s2349_s17 = sphi %s2405_s17, %s2827_s17   ;;  %s2345_s16 = sphi %s2403_s16, %s2826_s16   ;;  %s2341_s15 = sphi %s2401_s15, %s2825_s15  }
   0xb   : > { %p50_p0 = scmp.ne.s32.totalorder %s2349_s17, %s2345_s16  ;;  %p51_p1 = scmp.eq.s32.totalorder %s2361_s20, 0 }
   0xc   : > { %p56_p2 = scmp.ne.s32.totalorder %s2345_s16, %s2341_s15  ;;  %p2803_p3 = scmp.eq.s32.totalorder %s2430_s21, 0 }
   0xd   : > { %p52_p4 = por %p51_p1, %p50_p0  ;;  %p1550_p5 = scmp.ge.s32.totalorder %s2361_s20, 1 }
   0xe   : > { %p2441_p6 = por %p2803_p3, %p56_p2  ;;  %p166_p7 = scmp.lt.s32.totalorder %s2361_s20, 3 }
   0xf   : > { %s2363_s25 = smov [#allocation8]   ;;  %p1993_p10 = scmp.lt.s32.totalorder %s2361_s20, 2 }
  0x10   : > { %s2810_s23 = scalar_select %p2441_p6, 1, 0 }
  0x11   : > { %p2446_p8 = pnand %p1550_p5, %p166_p7  ;;  %s179_s26 = sshll.u32 %s2363_s25, 4  ;;  %s180_s26 = int_to_ptr.vmem [resolvable:$true] %s179_s26 }
  0x12   : > { %p2459_p12 = pnand %p1993_p10, %p52_p4  ;;  %s2364_s29 = smov [#allocation9]  }
  0x13   : > { %s2811_s24 = scalar_select %p2446_p8, 1, 0 }
  0x14   : > { %p1977_p9 = pneg %p2446_p8  ;;  %s192_s30 = sshll.u32 %s2364_s29, 4  ;;  %s193_s30 = int_to_ptr.vmem [resolvable:$true] %s192_s30 }
  0x15   : > { %s2813_s28 = scalar_select %p2459_p12, 1, 0 }
  0x16   : > { %p2455_p11 = pnand %p1977_p9, %p2803_p3  ;;  %s2153_s7 = scalar_lea.hbm %s2800_s2, 16 }
  0x17   : > { %p2154_p13 = scmp.ne.s32.totalorder %s2800_s2, %s2153_s7  ;;  %p2160_p4 = scmp.lt.u32.totalorder %s2153_s7, %s2800_s2 }
  0x18   : > { %p2155_p0 = pneg %p2455_p11 }
  0x1a   : > { %p2156_p1 = pnand %p2155_p0, %p2154_p13 }
  0x1c   : > { %p2157_p2 = pneg %p2156_p1 }
  0x1e   : > { %p2162_p5 = pnand %p2160_p4, %p2157_p2 }
  0x20   : > { %2165 = shalt.err (!%p2162_p5)
}
  0x21   : > { %s2166_s12 = scalar_lea.vmem %s180_s26, 16  ;;  %s2173_s13 = scalar_lea.vmem %s180_s26, 32 }
  0x22   : > { %p2167_p7 = scmp.ne.s32.totalorder %s180_s26, %s2166_s12  ;;  %p2174_p3 = scmp.lt.s32.totalorder %s180_s26, %s180_s26 }
  0x23   : > { %p2175_p6 = scmp.lt.s32.totalorder %s2173_s13, %s2166_s12 }
  0x24   : > { %p2169_p9 = pnand %p2167_p7, %p2155_p0 }
  0x25   : > { %p2176_p8 = por %p2175_p6, %p2174_p3 }
  0x26   : > { %p2170_p10 = pneg %p2169_p9 }
  0x28   : > { %p2177_p12 = pnand %p2176_p8, %p2170_p10 }
  0x2a   : > { %2180 = shalt.err (!%p2177_p12)
}
  0x2b   : > { %1980 = dma.hbm_to_vmem [thread:$0]  (!%p2455_p11), %s2800_s2, 16, %s180_s26, [#allocation7]  }
  0x2c   : > { %s2181_s5 = scalar_lea.hbm %s2801_s3, 1024 }
  0x2d   : > { %p2182_p13 = scmp.ne.s32.totalorder %s2801_s3, %s2181_s5  ;;  %p2188_p8 = scmp.lt.u32.totalorder %s2181_s5, %s2801_s3 }
  0x2f   : > { %p2184_p3 = pnand %p2182_p13, %p2155_p0 }
  0x31   : > { %p2185_p6 = pneg %p2184_p3 }
  0x33   : > { %p2190_p12 = pnand %p2188_p8, %p2185_p6 }
  0x35   : > { %2193 = shalt.err (!%p2190_p12)
}
  0x36   : > { %s2194_s26 = scalar_lea.vmem %s193_s30, 1024  ;;  %p2202_p5 = scmp.lt.s32.totalorder %s193_s30, %s193_s30 }
  0x37   : > { %p2195_p1 = scmp.ne.s32.totalorder %s193_s30, %s2194_s26  ;;  %p2203_p7 = scmp.lt.s32.totalorder %s2194_s26, %s2194_s26 }
  0x39   : > { %p2197_p2 = pnand %p2195_p1, %p2155_p0  ;;  %p2204_p9 = por %p2203_p7, %p2202_p5 }
  0x3b   : > { %p2198_p4 = pneg %p2197_p2 }
  0x3d   : > { %p2205_p10 = pnand %p2204_p9, %p2198_p4 }
  0x3f   : > { %2208 = shalt.err (!%p2205_p10)
}
  0x40   : > { %s2807_s10 = smov 64   ;;  %s2808_s11 = smov 4  }
  0x41   : > { %1983 = dma.hbm_to_vmem [thread:$0]  (!%p2455_p11), %s2801_s3, 1024, %s193_s30, [#allocation10], %s2807_s10, %s2807_s10, %s2808_s11  }
  0x42   : > { %s206_s14 = sand.u32 1, %s2349_s17   ;;  %s31_s15 = sadd.s32 1, %s2357_s19 }
  0x43   : > { %p32_p0 = scmp.ge.s32.totalorder %s31_s15, 2  ;;  %s2510_s25 = smul.u32 320, %s206_s14 }
  0x44   : > { %s1662_s29 = smul.u32 320, %s2357_s19  ;;  %s2814_s0 = sld [smem:[#allocation17_spill]] }
  0x45   : > { %s2831_s15 = smov (%p32_p0, %s31_s15), 0  ;;  %s210_s7 = scalar_lea.vmem [#allocation3], %s2510_s25 }
  0x46   : > { %s39_s30 = ssub.s32 %s2357_s19, %s2831_s15  ;;  %s220_s8 = sshll.u32 %s210_s7, 4  ;;  %s2523_s8 = int_to_ptr.vmem [resolvable:$true] %s220_s8 }
  0x47   : > { %p41_p11 = scmp.eq.s32.totalorder %s39_s30, 0  ;;  %s2530_s26 = scalar_lea.sflag [#allocation4], %s206_s14 }
  0x48   : > { %p2815_p3 = scmp.ne.s32.totalorder %s2813_s28, 0 }
  0x49   : > { %s2528_s9 = scalar_select %p41_p11, %s2349_s17, %s43_s22  }
  0x4a   : > { %s2518_s6 = scalar_lea.hbm %s2814_s0, %s1662_s29  ;;  %p2211_p6 = pneg %p2815_p3 }
  0x4b   : > { %s2209_s12 = scalar_lea.hbm %s2518_s6, 5120  ;;  %s2214_s5 = scalar_lea.hbm %s2814_s0, 10240 }
  0x4c   : > { %p2210_p13 = scmp.ne.s32.totalorder %s2518_s6, %s2209_s12  ;;  %p2215_p1 = scmp.lt.u32.totalorder %s2518_s6, %s2814_s0 }
  0x4d   : > { %p2216_p2 = scmp.lt.u32.totalorder %s2214_s5, %s2209_s12  ;;  %p2218_p5 = scmp.lt.u32.totalorder %s2209_s12, %s2518_s6 }
  0x4e   : > { %p2212_p8 = pnand %p2211_p6, %p2210_p13 }
  0x4f   : > { %p2217_p4 = por %p2216_p2, %p2215_p1 }
  0x50   : > { %p2213_p12 = pneg %p2212_p8 }
  0x51   : > { %p2219_p7 = por %p2218_p5, %p2217_p4 }
  0x53   : > { %p2220_p9 = pnand %p2219_p7, %p2213_p12 }
  0x55   : > { %2223 = shalt.err (!%p2220_p9)
}
  0x56   : > { %s2224_s22 = scalar_lea.vmem %s2523_s8, 5120  ;;  %s2367_s14 = smov [#allocation3]  }
  0x57   : > { %p2225_p10 = scmp.ne.s32.totalorder %s2523_s8, %s2224_s22  ;;  %s2229_s7 = sshll.u32 %s2367_s14, 4  ;;  %s2230_s7 = int_to_ptr.vmem [resolvable:$false] %s2229_s7 }
  0x58   : > { %s2231_s13 = scalar_lea.vmem %s2230_s7, 10240  ;;  %p2232_p13 = scmp.lt.s32.totalorder %s2523_s8, %s2230_s7 }
  0x59   : > { %p2227_p0 = pnand %p2225_p10, %p2211_p6  ;;  %p2233_p8 = scmp.lt.s32.totalorder %s2231_s13, %s2224_s22 }
  0x5b   : > { %p2228_p11 = pneg %p2227_p0  ;;  %p2234_p1 = por %p2233_p8, %p2232_p13 }
  0x5d   : > { %p2235_p2 = pnand %p2234_p1, %p2228_p11 }
  0x5f   : > { %2238 = shalt.err (!%p2235_p2)
}
  0x60   : > { %s2368_s12 = smov 640   ;;  %s2369_s29 = smov 320  }
  0x61   : > { %s2370_s5 = smov 20   ;;  %s230_s27 = sand.u32 1, %s2361_s20  }
  0x62   : > { %1987 = dma.hbm_to_vmem [thread:$0]  (!%p2815_p3), %s2518_s6, 5120, %s2523_s8, %s2530_s26, %s2368_s12, %s2369_s29, %s2370_s5  }
  0x63   : > { %s1663_s30 = smul.u32 5120, %s2357_s19  ;;  %s234_s14 = scalar_lea.vmem [#allocation6], %s2510_s25 }
  0x64   : > { %s241_s22 = sshll.u32 %s234_s14, 4  ;;  %s2568_s11 = scalar_lea.sflag [#allocation7], %s230_s27  ;;  %s2566_s22 = int_to_ptr.vmem [resolvable:$true] %s241_s22 }
  0x65   : > { %s2564_s10 = scalar_lea.hbm %s2799_s1, %s1663_s30  ;;  %s2244_s8 = scalar_lea.hbm %s2799_s1, 10240 }
  0x66   : > { %s2239_s0 = scalar_lea.hbm %s2564_s10, 5120  ;;  %p2245_p7 = scmp.lt.u32.totalorder %s2564_s10, %s2799_s1 }
  0x67   : > { %p2240_p12 = scmp.ne.s32.totalorder %s2564_s10, %s2239_s0  ;;  %p2246_p9 = scmp.lt.u32.totalorder %s2244_s8, %s2239_s0 }
  0x68   : > { %p2248_p0 = scmp.lt.u32.totalorder %s2239_s0, %s2564_s10 }
  0x69   : > { %p2242_p4 = pnand %p2240_p12, %p2211_p6  ;;  %p2247_p10 = por %p2246_p9, %p2245_p7 }
  0x6b   : > { %p2243_p5 = pneg %p2242_p4  ;;  %p2249_p11 = por %p2248_p0, %p2247_p10 }
  0x6d   : > { %p2250_p13 = pnand %p2249_p11, %p2243_p5 }
  0x6f   : > { %2253 = shalt.err (!%p2250_p13)
}
  0x70   : > { %s2254_s29 = scalar_lea.vmem %s2566_s22, 5120  ;;  %s2371_s5 = smov [#allocation6]  }
  0x71   : > { %p2255_p8 = scmp.ne.s32.totalorder %s2566_s22, %s2254_s29  ;;  %s2259_s27 = sshll.u32 %s2371_s5, 4  ;;  %s2260_s27 = int_to_ptr.vmem [resolvable:$false] %s2259_s27 }
  0x72   : > { %s2261_s30 = scalar_lea.vmem %s2260_s27, 10240  ;;  %p2262_p12 = scmp.lt.s32.totalorder %s2566_s22, %s2260_s27 }
  0x73   : > { %p2257_p1 = pnand %p2255_p8, %p2211_p6  ;;  %p2263_p4 = scmp.lt.s32.totalorder %s2261_s30, %s2254_s29 }
  0x75   : > { %p2258_p2 = pneg %p2257_p1  ;;  %p2264_p7 = por %p2263_p4, %p2262_p12 }
  0x77   : > { %p2265_p9 = pnand %p2264_p7, %p2258_p2 }
  0x79   : > { %2268 = shalt.err (!%p2265_p9)
}
  0x7a   : > { %s2816_s0 = smov 4   ;;  %s2817_s14 = smov 64  }
  0x7b   : > { %1990 = dma.hbm_to_vmem [thread:$0]  (!%p2815_p3), %s2564_s10, 5120, %s2566_s22, %s2568_s11, %s2817_s14, %s2817_s14, %s2816_s0  }
  0x7c   : > { %p2818_p6 = scmp.ne.s32.totalorder %s2811_s24, 0 }
  0x7d   : > { %s255_s7 = sand.u32 (!%p2818_p6), 1, %s2345_s16   ;;  %p2819_p5 = scmp.ne.s32.totalorder (!%p2818_p6), %s2810_s23, 0 }
  0x7e   : > { %253 = sbr.rel (%p2818_p6) target bundleno = 525 (0x20d), region = 36  ;;  %s256_s25 = scalar_lea.sflag (!%p2818_p6), [#allocation4], %s255_s7 }
  0x7f   : > { %s1960_s13 = smul.u32 (!%p2818_p6), 320, %s255_s7 }
  0x81   : > { %s2600_s6 = scalar_lea.vmem (!%p2818_p6), [#allocation3], %s1960_s13 }
  0x85   : > { %2320 = dma.done.wait (%p2819_p5), %s256_s25, 5120  }
  0x86   : > { %2322 = vsyncadd (%p2819_p5), %s256_s25, 4294962176  ;;  %s264_s28 = sand.u32 1, %s2430_s21   ;;  %s2607_s10 = scalar_lea.vmem [#allocation6], %s1960_s13 }
  0x87   : > { %s265_s8 = scalar_lea.sflag [#allocation7], %s264_s28 }
  0x88   : > { %2324 = dma.done.wait (%p2819_p5), %s265_s8, 5120  }
  0x89   : > { %2326 = vsyncadd (%p2819_p5), %s265_s8, 4294962176  ;;  %p2820_p3 = scmp.eq.s32.totalorder %s2430_s21, 0 }
  0x8b   : > { %2328 = dma.done.wait (%p2820_p3), [#allocation7], 16   ;;  %p2821_p10 = pmov %p2820_p3 }
  0x8c   : > { %p2822_p0 = pmov %p2820_p3 }
  0x8d   : > { %2330 = vsyncadd (%p2821_p10), [#allocation7], 4294967280 }
  0x8e   : > { %2332 = dma.done.wait (%p2822_p0), [#allocation10], 1024   ;;  %p2823_p11 = pmov %p2822_p0 }
  0x8f   : > { %p1559_p13 = scmp.ne.s32.totalorder %s2353_s18, 0 }
  0x90   : > { %2334 = vsyncadd (%p2823_p11), [#allocation10], 4294966272  ;;  %v2372_v0 = vmov (!%p1559_p13), 0.0  }
  0x91   : > { %310 = sbr.rel (%p1559_p13) target bundleno = 153 (0x99), region = 56  ;;  %311 = vst [vmem:[#allocation2] sm:$0xff] (!%p1559_p13), %v2372_v0  ;;  %312 = vst [vmem:[#allocation2 + $0x8] sm:$0xff] (!%p1559_p13), %v2372_v0 }
  0x92   : > { %313 = vst [vmem:[#allocation2 + $0x10] sm:$0xff] (!%p1559_p13), %v2372_v0  ;;  %314 = vst [vmem:[#allocation2 + $0x18] sm:$0xff] (!%p1559_p13), %v2372_v0 }
  0x93   : > { %315 = vst [vmem:[#allocation2 + $0x20] sm:$0xff] (!%p1559_p13), %v2372_v0  ;;  %316 = vst [vmem:[#allocation2 + $0x28] sm:$0xff] (!%p1559_p13), %v2372_v0 }
  0x94   : > { %317 = vst [vmem:[#allocation2 + $0x30] sm:$0xff] (!%p1559_p13), %v2372_v0  ;;  %318 = vst [vmem:[#allocation2 + $0x38] sm:$0xff] (!%p1559_p13), %v2372_v0 }
  0x95   : > { %319 = vst [vmem:[#allocation2 + $0x40] sm:$0xff] (!%p1559_p13), %v2372_v0  ;;  %320 = vst [vmem:[#allocation2 + $0x48] sm:$0xff] (!%p1559_p13), %v2372_v0 }
  0x96   : > { %321 = vst [vmem:[#allocation2 + $0x50] sm:$0xff] (!%p1559_p13), %v2372_v0  ;;  %322 = vst [vmem:[#allocation2 + $0x58] sm:$0xff] (!%p1559_p13), %v2372_v0 }
  0x97   : > { %323 = vst [vmem:[#allocation2 + $0x60] sm:$0xff] (!%p1559_p13), %v2372_v0  ;;  %324 = vst [vmem:[#allocation2 + $0x68] sm:$0xff] (!%p1559_p13), %v2372_v0 }
  0x98   : > { %325 = vst [vmem:[#allocation2 + $0x70] sm:$0xff] %v2372_v0  ;;  %326 = vst [vmem:[#allocation2 + $0x78] sm:$0xff] %v2372_v0 }
  0x99 PF: > { %v2057_v1 = vld [vmem:[%s2607_s10 + $0x40] sm:$0xff]   ;;  %v2061_v5 = vld [vmem:[%s2607_s10 + $0x48] sm:$0xff]   ;;  %v2065_v9 = vld [vmem:[%s2607_s10 + $0x50] sm:$0xff]   ;;  %p1640_p8 = scmp.ne.s32.totalorder %s2353_s18, 1 }
  0x9a   : > { %v2058_v2 = vld [vmem:[%s2607_s10 + $0xc0] sm:$0xff]   ;;  %1766 = vmatprep.subr.bf16.mxu0 %v2057_v1  ;;  %v2062_v6 = vld [vmem:[%s2607_s10 + $0xc8] sm:$0xff]   ;;  %v2066_v10 = vld [vmem:[%s2607_s10 + $0xd0] sm:$0xff]  }
  0x9b   : > { %v2059_v3 = vld [vmem:[%s2607_s10] sm:$0xff]   ;;  %1830 = vmatprep.subr.bf16.mxu1 %v2058_v2  ;;  %v2063_v7 = vld [vmem:[%s2607_s10 + $0x8] sm:$0xff]   ;;  %v2067_v11 = vld [vmem:[%s2607_s10 + $0x10] sm:$0xff]  }
  0x9c   : > { %v2060_v4 = vld [vmem:[%s2607_s10 + $0x80] sm:$0xff]   ;;  %1767 = vmatpush3.bf16.msra.mxu0 %v2059_v3  ;;  %v2064_v8 = vld [vmem:[%s2607_s10 + $0x88] sm:$0xff]   ;;  %v2068_v12 = vld [vmem:[%s2607_s10 + $0x90] sm:$0xff]  }
  0x9d   : > { %1831 = vmatpush3.bf16.msra.mxu1 %v2060_v4  ;;  %1768 = vmatprep.subr.bf16.mxu0 %v2061_v5  ;;  %v2069_v13 = vld [vmem:[%s2607_s10 + $0x58] sm:$0xff]   ;;  %v2073_v17 = vld [vmem:[%s2607_s10 + $0x60] sm:$0xff]   ;;  %v2077_v21 = vld [vmem:[%s2607_s10 + $0x68] sm:$0xff]  }
  0x9e   : > { %1832 = vmatprep.subr.bf16.mxu1 %v2062_v6  ;;  %v2070_v14 = vld [vmem:[%s2607_s10 + $0xd8] sm:$0xff]   ;;  %v2074_v18 = vld [vmem:[%s2607_s10 + $0xe0] sm:$0xff]   ;;  %v2078_v22 = vld [vmem:[%s2607_s10 + $0xe8] sm:$0xff]  }
  0x9f   : > { %v2071_v15 = vld [vmem:[%s2607_s10 + $0x18] sm:$0xff]   ;;  %v2075_v19 = vld [vmem:[%s2607_s10 + $0x20] sm:$0xff]   ;;  %v2079_v23 = vld [vmem:[%s2607_s10 + $0x28] sm:$0xff]  }
  0xa0   : > { %1769 = vmatpush3.bf16.msra.mxu0 %v2063_v7  ;;  %v2072_v16 = vld [vmem:[%s2607_s10 + $0x98] sm:$0xff]   ;;  %v2076_v20 = vld [vmem:[%s2607_s10 + $0xa0] sm:$0xff]   ;;  %v2080_v24 = vld [vmem:[%s2607_s10 + $0xa8] sm:$0xff]  }
  0xa1   : > { %1833 = vmatpush3.bf16.msra.mxu1 %v2064_v8  ;;  %1770 = vmatprep.subr.bf16.mxu0 %v2065_v9  ;;  %v2081_v25 = vld [vmem:[%s2607_s10 + $0x70] sm:$0xff]   ;;  %v2085_v29 = vld [vmem:[%s2607_s10 + $0x78] sm:$0xff]   ;;  %v2094_v36 = vld [vmem:[%s2600_s6 + $0xc] ss:$20 sps:$4 sm:$0xff]  }
  0xa2   : > { %1834 = vmatprep.subr.bf16.mxu1 %v2066_v10  ;;  %v2082_v26 = vld [vmem:[%s2607_s10 + $0xf0] sm:$0xff]   ;;  %v2086_v30 = vld [vmem:[%s2607_s10 + $0xf8] sm:$0xff]   ;;  %v2095_v37 = vld [vmem:[%s2607_s10 + $0x100] sm:$0xff]   ;;  %1048 = vmatprep.mubr.bf16.mxu1 %v2094_v36 }
  0xa3   : > { %v2083_v27 = vld [vmem:[%s2607_s10 + $0x30] sm:$0xff]   ;;  %v2087_v31 = vld [vmem:[%s2607_s10 + $0x38] sm:$0xff]   ;;  %v2096_v38 = vld [vmem:[%s2600_s6 + $0x2c] ss:$20 sps:$4 sm:$0xff]  }
  0xa4   : > { %1771 = vmatpush3.bf16.msra.mxu0 %v2067_v11  ;;  %v2084_v28 = vld [vmem:[%s2607_s10 + $0xb0] sm:$0xff]   ;;  %v2088_v32 = vld [vmem:[%s2607_s10 + $0xb8] sm:$0xff]   ;;  %v2102_v40 = vld [vmem:[%s2607_s10 + $0x108] sm:$0xff]  }
  0xa5   : > { %1835 = vmatpush3.bf16.msra.mxu1 %v2068_v12  ;;  %1772 = vmatprep.subr.bf16.mxu0 %v2069_v13  ;;  %v2089_v33 = vld [vmem:[%s2600_s6] ss:$20 sps:$4 sm:$0xff]   ;;  %v2091_v34 = vld [vmem:[%s2600_s6 + $0x4] ss:$20 sps:$4 sm:$0xff]   ;;  %v2092_v35 = vld [vmem:[%s2600_s6 + $0x8] ss:$20 sps:$4 sm:$0xff]  }
  0xa6   : > { %1836 = vmatprep.subr.bf16.mxu1 %v2070_v14  ;;  %951 = vmatprep.mubr.bf16.mxu0 %v2091_v34  ;;  %v2098_v39 = vld [vmem:[%s2600_s6 + $0x34] ss:$20 sps:$4 sm:$0xff]   ;;  %v2101_v42 = vld [vmem:[%s2600_s6 + $0x30] ss:$20 sps:$4 sm:$0xff]   ;;  %v2116_v46 = vld [vmem:[%s2607_s10 + $0x118] sm:$0xff]  }
  0xa7   : > { %v2100_v41 = vld [vmem:[%s2600_s6 + $0x28] ss:$20 sps:$4 sm:$0xff]   ;;  %v2109_v45 = vld [vmem:[%s2607_s10 + $0x110] sm:$0xff]   ;;  %v2108_v48 = vld [vmem:[%s2600_s6 + $0x58] ss:$20 sps:$4 sm:$0xff]  }
  0xa8   : > { %1773 = vmatpush3.bf16.msra.mxu0 %v2071_v15  ;;  %v2103_v43 = vld [vmem:[%s2600_s6 + $0x54] ss:$20 sps:$4 sm:$0xff]   ;;  %v2105_v44 = vld [vmem:[%s2600_s6 + $0x5c] ss:$20 sps:$4 sm:$0xff]   ;;  %v2112_v50 = vld [vmem:[%s2600_s6 + $0x84] ss:$20 sps:$4 sm:$0xff]  }
  0xa9   : > { %1837 = vmatpush3.bf16.msra.mxu1 %v2072_v16  ;;  %1774 = vmatprep.subr.bf16.mxu0 %v2073_v17  ;;  %v2107_v47 = vld [vmem:[%s2600_s6 + $0x50] ss:$20 sps:$4 sm:$0xff]   ;;  %v2130_v52 = vld [vmem:[%s2607_s10 + $0x128] sm:$0xff]   ;;  %v2115_v54 = vld [vmem:[%s2600_s6 + $0x80] ss:$20 sps:$4 sm:$0xff]  }
  0xaa   : > { %1838 = vmatprep.subr.bf16.mxu1 %v2074_v18  ;;  %v2110_v49 = vld [vmem:[%s2600_s6 + $0x7c] ss:$20 sps:$4 sm:$0xff]   ;;  %v2123_v51 = vld [vmem:[%s2607_s10 + $0x120] sm:$0xff]   ;;  %v2114_v53 = vld [vmem:[%s2600_s6 + $0x78] ss:$20 sps:$4 sm:$0xff]  }
  0xab   : > { %v2117_v55 = vld [vmem:[%s2600_s6 + $0xa4] ss:$20 sps:$4 sm:$0xff]   ;;  %v2137_v56 = vld [vmem:[%s2607_s10 + $0x130] sm:$0xff]   ;;  %v2119_v57 = vld [vmem:[%s2600_s6 + $0xac] ss:$20 sps:$4 sm:$0xff]  }
  0xac   : > { %1775 = vmatpush3.bf16.msra.mxu0 %v2075_v19  ;;  %v2144_v58 = vld [vmem:[%s2607_s10 + $0x138] sm:$0xff]   ;;  %v2121_v59 = vld [vmem:[%s2600_s6 + $0xa0] ss:$20 sps:$4 sm:$0xff]   ;;  %v2129_v0 = vld [vmem:[%s2600_s6 + $0xd0] ss:$20 sps:$4 sm:$0xff]  }
  0xad   : > { %1839 = vmatpush3.bf16.msra.mxu1 %v2076_v20  ;;  %1776 = vmatprep.subr.bf16.mxu0 %v2077_v21  ;;  %v2122_v60 = vld [vmem:[%s2600_s6 + $0xa8] ss:$20 sps:$4 sm:$0xff]   ;;  %v2124_v61 = vld [vmem:[%s2600_s6 + $0xcc] ss:$20 sps:$4 sm:$0xff]   ;;  %v2135_v3 = vld [vmem:[%s2600_s6 + $0xf0] ss:$20 sps:$4 sm:$0xff]  }
  0xae   : > { %1840 = vmatprep.subr.bf16.mxu1 %v2078_v22  ;;  %v2126_v62 = vld [vmem:[%s2600_s6 + $0xd4] ss:$20 sps:$4 sm:$0xff]   ;;  %v2133_v2 = vld [vmem:[%s2600_s6 + $0xfc] ss:$20 sps:$4 sm:$0xff]   ;;  %v2136_v4 = vld [vmem:[%s2600_s6 + $0xf8] ss:$20 sps:$4 sm:$0xff]  }
  0xaf   : > { %v2128_v63 = vld [vmem:[%s2600_s6 + $0xc8] ss:$20 sps:$4 sm:$0xff]   ;;  %v2140_v6 = vld [vmem:[%s2600_s6 + $0x124] ss:$20 sps:$4 sm:$0xff]   ;;  %v2143_v8 = vld [vmem:[%s2600_s6 + $0x120] ss:$20 sps:$4 sm:$0xff]  }
  0xb0   : > { %1777 = vmatpush3.bf16.msra.mxu0 %v2079_v23  ;;  %v2131_v1 = vld [vmem:[%s2600_s6 + $0xf4] ss:$20 sps:$4 sm:$0xff]   ;;  %v2138_v5 = vld [vmem:[%s2600_s6 + $0x11c] ss:$20 sps:$4 sm:$0xff]   ;;  %v2142_v7 = vld [vmem:[%s2600_s6 + $0x118] ss:$20 sps:$4 sm:$0xff]  }
  0xb1   : > { %1841 = vmatpush3.bf16.msra.mxu1 %v2080_v24  ;;  %1778 = vmatprep.subr.bf16.mxu0 %v2081_v25  ;;  %v2145_v9 = vld [vmem:[%s2600_s6 + $0x10] ss:$20 sps:$4 sm:$0xff]   ;;  %v2147_v11 = vld [vmem:[%s2600_s6 + $0x38] ss:$20 sps:$4 sm:$0xff]   ;;  %v2149_v13 = vld [vmem:[%s2600_s6 + $0x60] ss:$20 sps:$4 sm:$0xff]  }
  0xb2   : > { %1842 = vmatprep.subr.bf16.mxu1 %v2082_v26  ;;  %v2146_v10 = vld [vmem:[%s2600_s6 + $0xb0] ss:$20 sps:$4 sm:$0xff]   ;;  %v2148_v12 = vld [vmem:[%s2600_s6 + $0xd8] ss:$20 sps:$4 sm:$0xff]   ;;  %v2150_v14 = vld [vmem:[%s2600_s6 + $0x100] ss:$20 sps:$4 sm:$0xff]  }
  0xb3   : > { %v2151_v15 = vld [vmem:[%s2600_s6 + $0x88] ss:$20 sps:$4 sm:$0xff]  }
  0xb4   : > { %1779 = vmatpush3.bf16.msra.mxu0 %v2083_v27  ;;  %v2152_v16 = vld [vmem:[%s2600_s6 + $0x128] ss:$20 sps:$4 sm:$0xff]  }
  0xb5   : > { %1843 = vmatpush3.bf16.msra.mxu1 %v2084_v28  ;;  %1780 = vmatprep.subr.bf16.mxu0 %v2085_v29 }
  0xb6   : > { %1844 = vmatprep.subr.bf16.mxu1 %v2086_v30 }
  0xb8   : > { %1781 = vmatpush3.bf16.msra.mxu0 %v2087_v31 }
  0xb9   : > { %1845 = vmatpush3.bf16.msra.mxu1 %v2088_v32  ;;  %1910 = vmatprep.subr.bf16.mxu0 %v2095_v37 }
  0xba   : > { %1942 = vmatprep.subr.bf16.mxu1 %v2095_v37 }
  0xbb   : > { %952 = vmatmul.mubr.bf16.vlgmr.msra.gmra.mrb[0].mxu0 %v2089_v33 }
  0xbc   : > { %1049 = vmatmul.mubr.bf16.vlgmr.msra.gmra.mrb[0].mxu1 %v2092_v35  ;;  %1911 = vmatpush3.bf16.msra.mxu0 %v2095_v37 }
  0xbd   : > { %1950 = vmatpush3.bf16.msra.mxu1 %v2095_v37  ;;  %959 = vmatprep.mubr.bf16.mxu0 %v2096_v38 }
  0xbe   : > { %1056 = vmatprep.mubr.bf16.mxu1 %v2098_v39  ;;  %1912 = vmatprep.subr.bf16.mxu0 %v2102_v40 }
  0xbf   : > { %1943 = vmatprep.subr.bf16.mxu1 %v2102_v40 }
  0xc0   : > { %1913 = vmatpush3.bf16.msra.mxu0 %v2102_v40 }
  0xc1   : > { %1951 = vmatpush3.bf16.msra.mxu1 %v2102_v40  ;;  %1914 = vmatprep.subr.bf16.mxu0 %v2109_v45 }
  0xc2   : > { %1944 = vmatprep.subr.bf16.mxu1 %v2109_v45 }
  0xc3   : > { %960 = vmatmul.mubr.bf16.gmra.mrb[4].mxu0 %v2100_v41 }
  0xc4   : > { %1057 = vmatmul.mubr.bf16.gmra.mrb[4].mxu1 %v2101_v42  ;;  %967 = vmatprep.mubr.bf16.mxu0 %v2103_v43 }
  0xc5   : > { %1064 = vmatprep.mubr.bf16.mxu1 %v2105_v44  ;;  %1915 = vmatpush3.bf16.msra.mxu0 %v2109_v45 }
  0xc6   : > { %1952 = vmatpush3.bf16.msra.mxu1 %v2109_v45  ;;  %1916 = vmatprep.subr.bf16.mxu0 %v2116_v46 }
  0xc7   : > { %1945 = vmatprep.subr.bf16.mxu1 %v2116_v46 }
  0xc9   : > { %1917 = vmatpush3.bf16.msra.mxu0 %v2116_v46 }
  0xca   : > { %1953 = vmatpush3.bf16.msra.mxu1 %v2116_v46  ;;  %1918 = vmatprep.subr.bf16.mxu0 %v2123_v51 }
  0xcb   : > { %968 = vmatmul.mubr.bf16.gmra.mrb[8].mxu0 %v2107_v47  ;;  %1946 = vmatprep.subr.bf16.mxu1 %v2123_v51 }
  0xcc   : > { %1065 = vmatmul.mubr.bf16.gmra.mrb[8].mxu1 %v2108_v48  ;;  %975 = vmatprep.mubr.bf16.mxu0 %v2110_v49 }
  0xcd   : > { %1072 = vmatprep.mubr.bf16.mxu1 %v2112_v50  ;;  %1919 = vmatpush3.bf16.msra.mxu0 %v2123_v51 }
  0xce   : > { %1954 = vmatpush3.bf16.msra.mxu1 %v2123_v51  ;;  %1920 = vmatprep.subr.bf16.mxu0 %v2130_v52 }
  0xcf   : > { %1947 = vmatprep.subr.bf16.mxu1 %v2130_v52 }
  0xd1   : > { %1921 = vmatpush3.bf16.msra.mxu0 %v2130_v52 }
  0xd2   : > { %1955 = vmatpush3.bf16.msra.mxu1 %v2130_v52  ;;  %1922 = vmatprep.subr.bf16.mxu0 %v2137_v56 }
  0xd3   : > { %976 = vmatmul.mubr.bf16.gmra.mrb[12].mxu0 %v2114_v53  ;;  %1948 = vmatprep.subr.bf16.mxu1 %v2137_v56 }
  0xd4   : > { %1073 = vmatmul.mubr.bf16.gmra.mrb[12].mxu1 %v2115_v54  ;;  %983 = vmatprep.mubr.bf16.mxu0 %v2117_v55 }
  0xd5   : > { %1080 = vmatprep.mubr.bf16.mxu1 %v2119_v57  ;;  %1923 = vmatpush3.bf16.msra.mxu0 %v2137_v56 }
  0xd6   : > { %1956 = vmatpush3.bf16.msra.mxu1 %v2137_v56  ;;  %1924 = vmatprep.subr.bf16.mxu0 %v2144_v58 }
  0xd7   : > { %1949 = vmatprep.subr.bf16.mxu1 %v2144_v58 }
  0xd9   : > { %1925 = vmatpush3.bf16.msra.mxu0 %v2144_v58 }
  0xda   : > { %1957 = vmatpush3.bf16.msra.mxu1 %v2144_v58 }
  0xdb   : > { %984 = vmatmul.mubr.bf16.gmra.mrb[16].mxu0 %v2121_v59 }
  0xdc   : > { %1081 = vmatmul.mubr.bf16.gmra.mrb[16].mxu1 %v2122_v60  ;;  %991 = vmatprep.mubr.bf16.mxu0 %v2124_v61 }
  0xdd   : > { %1088 = vmatprep.mubr.bf16.mxu1 %v2126_v62 }
  0xe3   : > { %992 = vmatmul.mubr.bf16.gmra.mrb[20].mxu0 %v2128_v63 }
  0xe4   : > { %1089 = vmatmul.mubr.bf16.gmra.mrb[20].mxu1 %v2129_v0  ;;  %999 = vmatprep.mubr.bf16.mxu0 %v2131_v1 }
  0xe5   : > { %1096 = vmatprep.mubr.bf16.mxu1 %v2133_v2 }
  0xeb   : > { %1000 = vmatmul.mubr.bf16.gmra.mrb[24].mxu0 %v2135_v3 }
  0xec   : > { %1097 = vmatmul.mubr.bf16.gmra.mrb[24].mxu1 %v2136_v4  ;;  %1007 = vmatprep.mubr.bf16.mxu0 %v2138_v5 }
  0xed   : > { %1104 = vmatprep.mubr.bf16.mxu1 %v2140_v6 }
  0xf3   : > { %1008 = vmatmul.mubr.bf16.gmra.mrb[28].mxu0 %v2142_v7 }
  0xf4   : > { %1105 = vmatmul.mubr.bf16.gmra.mrb[28].mxu1 %v2143_v8  ;;  %1926 = vmatprep.mubr.bf16.mxu0 %v2145_v9 }
  0xf5   : > { %1934 = vmatprep.mubr.bf16.mxu1 %v2146_v10 }
  0xfb   : > { %1927 = vmatmul.mubr.bf16.vlgmr.msra.gmra.mrb[32].mxu0 %v2147_v11 }
  0xfc   : > { %1935 = vmatmul.mubr.bf16.vlgmr.msra.gmra.mrb[32].mxu1 %v2148_v12  ;;  %1930 = vmatprep.mubr.bf16.mxu0 %v2149_v13 }
  0xfd   : > { %1938 = vmatprep.mubr.bf16.mxu1 %v2150_v14 }
 0x103   : > { %1931 = vmatmul.mubr.bf16.gmra.mrb[36].mxu0 %v2151_v15 }
 0x104   : > { %1939 = vmatmul.mubr.bf16.gmra.mrb[36].mxu1 %v2152_v16 }
 0x18e   : > { %v1782_v17 = vpop.f32.mrb[0].mxu0 }
 0x18f   : > { %v1846_v18 = vpop.f32.mrb[0].mxu1  ;;  %v1783_v19 = vpop.f32.mrb[1].mxu0 }
 0x190   : > { %v1784_v20 = vadd.f32 %v1783_v19, %v1782_v17  ;;  %v1847_v21 = vpop.f32.mrb[1].mxu1  ;;  %v1785_v22 = vpop.f32.mrb[2].mxu0 }
 0x191   : > { %v1848_v23 = vadd.f32 %v1847_v21, %v1846_v18  ;;  %v1849_v24 = vpop.f32.mrb[2].mxu1  ;;  %v1786_v25 = vpop.f32.mrb[3].mxu0 }
 0x192   : > { %v1787_v26 = vadd.f32 %v1786_v25, %v1785_v22  ;;  %v1850_v27 = vpop.f32.mrb[3].mxu1 }
 0x193   : > { %v1851_v28 = vadd.f32 %v1850_v27, %v1849_v24  ;;  %v2702_v29 = vadd.f32 %v1848_v23, %v1784_v20 }
 0x195   : > { %v2704_v30 = vadd.f32 %v1851_v28, %v1787_v26 }
 0x196   : > { %v1788_v31 = vpop.f32.mrb[4].mxu0 }
 0x197   : > { %v1852_v32 = vpop.f32.mrb[4].mxu1  ;;  %v1789_v33 = vpop.f32.mrb[5].mxu0 }
 0x198   : > { %v1790_v34 = vadd.f32 %v1789_v33, %v1788_v31  ;;  %v1853_v35 = vpop.f32.mrb[5].mxu1  ;;  %v1791_v36 = vpop.f32.mrb[6].mxu0 }
 0x199   : > { %v1854_v37 = vadd.f32 %v1853_v35, %v1852_v32  ;;  %v1855_v38 = vpop.f32.mrb[6].mxu1  ;;  %v1792_v39 = vpop.f32.mrb[7].mxu0 }
 0x19a   : > { %v1793_v40 = vadd.f32 %v1792_v39, %v1791_v36  ;;  %v1856_v41 = vpop.f32.mrb[7].mxu1 }
 0x19b   : > { %v1857_v42 = vadd.f32 %v1856_v41, %v1855_v38  ;;  %v2706_v43 = vadd.f32 %v1854_v37, %v1790_v34 }
 0x19d   : > { %v2708_v44 = vadd.f32 %v1857_v42, %v1793_v40 }
 0x19e   : > { %v1794_v45 = vpop.f32.mrb[8].mxu0 }
 0x19f   : > { %v1858_v46 = vpop.f32.mrb[8].mxu1  ;;  %v1795_v47 = vpop.f32.mrb[9].mxu0 }
 0x1a0   : > { %v1796_v48 = vadd.f32 %v1795_v47, %v1794_v45  ;;  %v1859_v49 = vpop.f32.mrb[9].mxu1  ;;  %v1797_v50 = vpop.f32.mrb[10].mxu0 }
 0x1a1   : > { %v1860_v51 = vadd.f32 %v1859_v49, %v1858_v46  ;;  %v1861_v52 = vpop.f32.mrb[10].mxu1  ;;  %v1798_v53 = vpop.f32.mrb[11].mxu0 }
 0x1a2   : > { %v1799_v54 = vadd.f32 %v1798_v53, %v1797_v50  ;;  %v1862_v55 = vpop.f32.mrb[11].mxu1 }
 0x1a3   : > { %v1863_v56 = vadd.f32 %v1862_v55, %v1861_v52  ;;  %v2710_v57 = vadd.f32 %v1860_v51, %v1796_v48 }
 0x1a5   : > { %v2712_v58 = vadd.f32 %v1863_v56, %v1799_v54 }
 0x1a6   : > { %v1800_v59 = vpop.f32.mrb[12].mxu0 }
 0x1a7   : > { %v1864_v60 = vpop.f32.mrb[12].mxu1  ;;  %v1801_v61 = vpop.f32.mrb[13].mxu0 }
 0x1a8   : > { %v1802_v62 = vadd.f32 %v1801_v61, %v1800_v59  ;;  %v1865_v63 = vpop.f32.mrb[13].mxu1  ;;  %v1803_v0 = vpop.f32.mrb[14].mxu0 }
 0x1a9   : > { %v1866_v1 = vadd.f32 %v1865_v63, %v1864_v60  ;;  %v1867_v2 = vpop.f32.mrb[14].mxu1  ;;  %v1804_v3 = vpop.f32.mrb[15].mxu0 }
 0x1aa   : > { %v1805_v4 = vadd.f32 %v1804_v3, %v1803_v0  ;;  %v1868_v5 = vpop.f32.mrb[15].mxu1 }
 0x1ab   : > { %v1869_v6 = vadd.f32 %v1868_v5, %v1867_v2  ;;  %v2714_v7 = vadd.f32 %v1866_v1, %v1802_v62 }
 0x1ad   : > { %v2716_v8 = vadd.f32 %v1869_v6, %v1805_v4 }
 0x1ae   : > { %v1806_v9 = vpop.f32.mrb[16].mxu0 }
 0x1af   : > { %v1870_v10 = vpop.f32.mrb[16].mxu1  ;;  %v1807_v11 = vpop.f32.mrb[17].mxu0 }
 0x1b0   : > { %v1808_v12 = vadd.f32 %v1807_v11, %v1806_v9  ;;  %v1871_v13 = vpop.f32.mrb[17].mxu1  ;;  %v1809_v14 = vpop.f32.mrb[18].mxu0  ;;  %v329_v9 = vld [vmem:[#allocation2 + $0x10] sm:$0xff] }
 0x1b1   : > { %v1872_v15 = vadd.f32 %v1871_v13, %v1870_v10  ;;  %v1873_v16 = vpop.f32.mrb[18].mxu1  ;;  %v1810_v17 = vpop.f32.mrb[19].mxu0 }
 0x1b2   : > { %v1811_v18 = vadd.f32 %v1810_v17, %v1809_v14  ;;  %v1874_v19 = vpop.f32.mrb[19].mxu1  ;;  %v327_v14 = vld [vmem:[#allocation2] sm:$0xff] }
 0x1b3   : > { %v1875_v20 = vadd.f32 %v1874_v19, %v1873_v16  ;;  %v1083_v21 = vadd.f32 %v1872_v15, %v1808_v12  ;;  %v337_v12 = vld [vmem:[#allocation2 + $0x50] sm:$0xff] }
 0x1b5   : > { %v2718_v22 = vadd.f32 %v1875_v20, %v1811_v18  ;;  %v335_v18 = vld [vmem:[#allocation2 + $0x40] sm:$0xff]  ;;  %v330_v20 = vld [vmem:[#allocation2 + $0x18] sm:$0xff] }
 0x1b6   : > { %v1812_v23 = vpop.f32.mrb[20].mxu0 }
 0x1b7   : > { %v1876_v24 = vpop.f32.mrb[20].mxu1  ;;  %v1813_v25 = vpop.f32.mrb[21].mxu0 }
 0x1b8   : > { %v1814_v26 = vadd.f32 %v1813_v25, %v1812_v23  ;;  %v1877_v27 = vpop.f32.mrb[21].mxu1  ;;  %v1815_v28 = vpop.f32.mrb[22].mxu0 }
 0x1b9   : > { %v1878_v31 = vadd.f32 %v1877_v27, %v1876_v24  ;;  %v1879_v32 = vpop.f32.mrb[22].mxu1  ;;  %v1816_v33 = vpop.f32.mrb[23].mxu0  ;;  %v338_v27 = vld [vmem:[#allocation2 + $0x58] sm:$0xff] }
 0x1ba   : > { %v1817_v34 = vadd.f32 %v1816_v33, %v1815_v28  ;;  %v1880_v35 = vpop.f32.mrb[23].mxu1 }
 0x1bb   : > { %v1881_v36 = vadd.f32 %v1880_v35, %v1879_v32  ;;  %v1091_v37 = vadd.f32 %v1878_v31, %v1814_v26  ;;  %v328_v31 = vld [vmem:[#allocation2 + $0x8] sm:$0xff] }
 0x1bd   : > { %v1094_v38 = vadd.f32 %v1881_v36, %v1817_v34  ;;  %v336_v36 = vld [vmem:[#allocation2 + $0x48] sm:$0xff] }
 0x1be   : > { %v1818_v39 = vpop.f32.mrb[24].mxu0 }
 0x1bf   : > { %v1882_v40 = vpop.f32.mrb[24].mxu1  ;;  %v1819_v41 = vpop.f32.mrb[25].mxu0 }
 0x1c0   : > { %v1820_v42 = vadd.f32 %v1819_v41, %v1818_v39  ;;  %v1883_v45 = vpop.f32.mrb[25].mxu1  ;;  %v1821_v46 = vpop.f32.mrb[26].mxu0 }
 0x1c1   : > { %v1884_v47 = vadd.f32 %v1883_v45, %v1882_v40  ;;  %v1885_v48 = vpop.f32.mrb[26].mxu1  ;;  %v1822_v49 = vpop.f32.mrb[27].mxu0  ;;  %v341_v45 = vld [vmem:[#allocation2 + $0x70] sm:$0xff] }
 0x1c2   : > { %v1823_v50 = vadd.f32 %v1822_v49, %v1821_v46  ;;  %v1886_v51 = vpop.f32.mrb[27].mxu1 }
 0x1c3   : > { %v1887_v52 = vadd.f32 %v1886_v51, %v1885_v48  ;;  %v2720_v53 = vadd.f32 %v1884_v47, %v1820_v42  ;;  %v333_v42 = vld [vmem:[#allocation2 + $0x30] sm:$0xff]  ;;  %v331_v47 = vld [vmem:[#allocation2 + $0x20] sm:$0xff] }
 0x1c5   : > { %v2722_v54 = vadd.f32 %v1887_v52, %v1823_v50  ;;  %v339_v50 = vld [vmem:[#allocation2 + $0x60] sm:$0xff]  ;;  %v334_v52 = vld [vmem:[#allocation2 + $0x38] sm:$0xff] }
 0x1c6   : > { %v1824_v55 = vpop.f32.mrb[28].mxu0 }
 0x1c7   : > { %v1888_v56 = vpop.f32.mrb[28].mxu1  ;;  %v1825_v59 = vpop.f32.mrb[29].mxu0 }
 0x1c8   : > { %v1826_v60 = vadd.f32 %v1825_v59, %v1824_v55  ;;  %v1889_v61 = vpop.f32.mrb[29].mxu1  ;;  %v1827_v62 = vpop.f32.mrb[30].mxu0 }
 0x1c9   : > { %v1890_v63 = vadd.f32 %v1889_v61, %v1888_v56  ;;  %v1891_v0 = vpop.f32.mrb[30].mxu1  ;;  %v1828_v1 = vpop.f32.mrb[31].mxu0  ;;  %v342_v61 = vld [vmem:[#allocation2 + $0x78] sm:$0xff] }
 0x1ca   : > { %v1829_v2 = vadd.f32 %v1828_v1, %v1827_v62  ;;  %v1892_v3 = vpop.f32.mrb[31].mxu1 }
 0x1cb   : > { %v1893_v4 = vadd.f32 %v1892_v3, %v1891_v0  ;;  %v1107_v5 = vadd.f32 %v1890_v63, %v1826_v60  ;;  %v332_v63 = vld [vmem:[#allocation2 + $0x28] sm:$0xff] }
 0x1cd   : > { %v2724_v6 = vadd.f32 %v1893_v4, %v1829_v2 }
 0x1ce   : > { %v1928_v10 = vpop.f32.mrb[32].mxu0 }
 0x1cf   : > { %v1156_v11 = vadd.f32 %v1928_v10, %v2706_v43  ;;  %v1936_v13 = vpop.f32.mrb[32].mxu1  ;;  %v1147_v15 = vpop.f32.mrb[33].mxu0 }
 0x1d0   : > { %v1188_v16 = vadd.f32 %v1936_v13, %v1091_v37  ;;  %v1148_v17 = vadd.f32 %v1147_v15, %v2702_v29  ;;  %v1179_v19 = vpop.f32.mrb[33].mxu1  ;;  %v1929_v23 = vpop.f32.mrb[34].mxu0 }
 0x1d1   : > { %v1212_v24 = vadd.f32 %v1156_v11, %v329_v9  ;;  %v1180_v25 = vadd.f32 %v1179_v19, %v1083_v21  ;;  %v1159_v26 = vadd.f32 %v1929_v23, %v2708_v44  ;;  %v1937_v28 = vpop.f32.mrb[34].mxu1  ;;  %v1150_v32 = vpop.f32.mrb[35].mxu0  ;;  %v1752_v23 = vld [vmem:[#allocation9 + $0x8] sm:$0xff] (!%p1640_p8)  }
 0x1d2   : > { %v1220_v43 = vadd.f32 %v1188_v16, %v337_v12  ;;  %v1210_v33 = vadd.f32 %v1148_v17, %v327_v14  ;;  %v1191_v34 = vadd.f32 %v1937_v28, %v1094_v38  ;;  %v1151_v35 = vadd.f32 %v1150_v32, %v2704_v30  ;;  %v1182_v37 = vpop.f32.mrb[35].mxu1  ;;  %v2739_v12 = vld [vmem:[#allocation8] ss:$0 sm:$0xff] (!%p1640_p8)  ;;  %v1681_v14 = vld [vmem:[#allocation9] sm:$0xff] (!%p1640_p8)   ;;  %v1753_v32 = vld [vmem:[#allocation9 + $0x10] sm:$0xff] (!%p1640_p8)  }
 0x1d3   : > { %1228 = vst [vmem:[#allocation2 + $0x10] sm:$0xff] %v1212_v24  ;;  %v1218_v29 = vadd.f32 %v1180_v25, %v335_v18  ;;  %v1213_v39 = vadd.f32 %v1159_v26, %v330_v20  ;;  %v1183_v40 = vadd.f32 %v1182_v37, %v2718_v22  ;;  %v1682_v17 = vunpack.c.l.bf16 (!%p1640_p8), %v1681_v14 }
 0x1d4   : > { %1236 = vst [vmem:[#allocation2 + $0x50] sm:$0xff] %v1220_v43  ;;  %1226 = vst [vmem:[#allocation2] sm:$0xff] %v1210_v33  ;;  %v1221_v21 = vadd.f32 %v1191_v34, %v338_v27  ;;  %v1211_v44 = vadd.f32 %v1151_v35, %v328_v31  ;;  %v1683_v18 = vunpack.c.h.bf16 (!%p1640_p8), %v1681_v14  ;;  %v1686_v26 = vunpack.c.l.bf16 (!%p1640_p8), %v1752_v23 }
 0x1d5   : > { %1234 = vst [vmem:[#allocation2 + $0x40] sm:$0xff] %v1218_v29  ;;  %1229 = vst [vmem:[#allocation2 + $0x18] sm:$0xff] %v1213_v39  ;;  %v1219_v41 = vadd.f32 %v1183_v40, %v336_v36  ;;  %v1687_v27 = vunpack.c.h.bf16 (!%p1640_p8), %v1752_v23  ;;  %v1690_v36 = vunpack.c.l.bf16 (!%p1640_p8), %v1753_v32  ;;  %v1691_v37 = vunpack.c.h.bf16 (!%p1640_p8), %v1753_v32  ;;  %v1754_v29 = vld [vmem:[#allocation9 + $0x18] sm:$0xff] (!%p1640_p8)  }
 0x1d6   : > { %1237 = vst [vmem:[#allocation2 + $0x58] sm:$0xff] %v1221_v21  ;;  %1227 = vst [vmem:[#allocation2 + $0x8] sm:$0xff] %v1211_v44  ;;  %v1932_v38 = vpop.f32.mrb[36].mxu0 }
 0x1d7   : > { %1235 = vst [vmem:[#allocation2 + $0x48] sm:$0xff] %v1219_v41  ;;  %v1172_v30 = vadd.f32 %v1932_v38, %v2714_v7  ;;  %v1940_v46 = vpop.f32.mrb[36].mxu1  ;;  %v1163_v48 = vpop.f32.mrb[37].mxu0 }
 0x1d8   : > { %v1204_v49 = vadd.f32 %v1940_v46, %v1107_v5  ;;  %v1164_v22 = vadd.f32 %v1163_v48, %v2710_v57  ;;  %v1195_v51 = vpop.f32.mrb[37].mxu1  ;;  %v1933_v55 = vpop.f32.mrb[38].mxu0  ;;  %v340_v57 = vld [vmem:[#allocation2 + $0x68] sm:$0xff] }
 0x1d9   : > { %v1216_v56 = vadd.f32 %v1172_v30, %v333_v42  ;;  %v1196_v59 = vadd.f32 %v1195_v51, %v2720_v53  ;;  %v1175_v60 = vadd.f32 %v1933_v55, %v2716_v8  ;;  %v1941_v62 = vpop.f32.mrb[38].mxu1  ;;  %v1166_v7 = vpop.f32.mrb[39].mxu0  ;;  %1245 = sbr.rel (%p1640_p8) target bundleno = 499 (0x1f3), region = 60 }
 0x1da   : > { %v1224_v0 = vadd.f32 %v1204_v49, %v341_v45  ;;  %v1214_v1 = vadd.f32 %v1164_v22, %v331_v47  ;;  %v1207_v2 = vadd.f32 %v1941_v62, %v2724_v6  ;;  %v1167_v3 = vadd.f32 %v1166_v7, %v2712_v58  ;;  %v1198_v4 = vpop.f32.mrb[39].mxu1  ;;  %v1248_v15 = vld [vmem:[#allocation2 + $0x10] sm:$0xff] (!%p1640_p8) }
 0x1db   : > { %1232 = vst [vmem:[#allocation2 + $0x30] sm:$0xff] %v1216_v56  ;;  %v1222_v5 = vadd.f32 %v1196_v59, %v339_v50  ;;  %v1217_v9 = vadd.f32 %v1175_v60, %v334_v52  ;;  %v1199_v10 = vadd.f32 %v1198_v4, %v2722_v54  ;;  %v1246_v58 = vld [vmem:[#allocation2] sm:$0xff] (!%p1640_p8)  ;;  %v1271_v19 = vadd.f32 (!%p1640_p8), %v2739_v12, %v1248_v15  ;;  %v1256_v51 = vld [vmem:[#allocation2 + $0x50] sm:$0xff] (!%p1640_p8) }
 0x1dc   : > { %1240 = vst [vmem:[#allocation2 + $0x70] sm:$0xff] %v1224_v0  ;;  %1230 = vst [vmem:[#allocation2 + $0x20] sm:$0xff] %v1214_v1  ;;  %v1225_v8 = vadd.f32 %v1207_v2, %v342_v61  ;;  %v1215_v53 = vadd.f32 %v1167_v3, %v332_v63  ;;  %v1269_v13 = vadd.f32 (!%p1640_p8), %v2739_v12, %v1246_v58  ;;  %v1249_v16 = vld [vmem:[#allocation2 + $0x18] sm:$0xff] (!%p1640_p8)  ;;  %v1254_v41 = vld [vmem:[#allocation2 + $0x40] sm:$0xff] (!%p1640_p8)  ;;  %v1694_v49 = vunpack.c.l.bf16 (!%p1640_p8), %v1754_v29 }
 0x1dd   : > { %1238 = vst [vmem:[#allocation2 + $0x60] sm:$0xff] %v1222_v5  ;;  %1233 = vst [vmem:[#allocation2 + $0x38] sm:$0xff] %v1217_v9  ;;  %v1223_v11 = vadd.f32 %v1199_v10, %v340_v57  ;;  %v1247_v6 = vld [vmem:[#allocation2 + $0x8] sm:$0xff] (!%p1640_p8)  ;;  %v1272_v20 = vadd.f32 (!%p1640_p8), %v2739_v12, %v1249_v16  ;;  %v1319_v39 = vadd.f32 (!%p1640_p8), %v1686_v26, %v1271_v19  ;;  %v1695_v22 = vunpack.c.h.bf16 (!%p1640_p8), %v1754_v29  ;;  %v1257_v60 = vld [vmem:[#allocation2 + $0x58] sm:$0xff] (!%p1640_p8) }
 0x1de   : > { %1241 = vst [vmem:[#allocation2 + $0x78] sm:$0xff] %v1225_v8  ;;  %1231 = vst [vmem:[#allocation2 + $0x28] sm:$0xff] %v1215_v53  ;;  %v1270_v54 = vadd.f32 (!%p1640_p8), %v2739_v12, %v1247_v6  ;;  %v1317_v34 = vadd.f32 (!%p1640_p8), %v1682_v17, %v1269_v13  ;;  %v1255_v46 = vld [vmem:[#allocation2 + $0x48] sm:$0xff] (!%p1640_p8)  ;;  %v1277_v59 = vadd.f32 (!%p1640_p8), %v2739_v12, %v1254_v41  ;;  %v1757_v9 = vld [vmem:[#allocation9 + $0x30] sm:$0xff] (!%p1640_p8)  }
 0x1df   : > { %1239 = vst [vmem:[#allocation2 + $0x68] sm:$0xff] %v1223_v11  ;;  %v1320_v40 = vadd.f32 (!%p1640_p8), %v1687_v27, %v1272_v20  ;;  %v1335_v47 = vmax.f32 (!%p1640_p8), %v1319_v39, 0.0  ;;  %v1755_v50 = vld [vmem:[#allocation9 + $0x20] sm:$0xff] (!%p1640_p8)   ;;  %v1756_v61 = vld [vmem:[#allocation9 + $0x28] sm:$0xff] (!%p1640_p8)   ;;  %v1278_v0 = vadd.f32 (!%p1640_p8), %v2739_v12, %v1255_v46  ;;  %v1279_v4 = vadd.f32 (!%p1640_p8), %v2739_v12, %v1256_v51  ;;  %v1758_v20 = vld [vmem:[#allocation9 + $0x38] sm:$0xff] (!%p1640_p8)  }
 0x1e0   : > { %v1318_v35 = vadd.f32 %v1683_v18, %v1270_v54  ;;  %v1333_v42 = vmax.f32 %v1317_v34, 0.0  ;;  %v1698_v3 = vunpack.c.l.bf16 %v1755_v50  ;;  %v1699_v57 = vunpack.c.h.bf16 %v1755_v50 }
 0x1e1   : > { %v1336_v48 = vmax.f32 %v1320_v40, 0.0  ;;  %v1280_v53 = vadd.f32 %v2739_v12, %v1257_v60  ;;  %v1702_v11 = vunpack.c.l.bf16 %v1756_v61  ;;  %v1703_v13 = vunpack.c.h.bf16 %v1756_v61 }
 0x1e2   : > { %v1252_v43 = vld [vmem:[#allocation2 + $0x30] sm:$0xff]  ;;  %v1334_v38 = vmax.f32 %v1318_v35, 0.0  ;;  %v1325_v58 = vadd.f32 %v1698_v3, %v1277_v59  ;;  %v1326_v6 = vadd.f32 %v1699_v57, %v1278_v0  ;;  %v1706_v19 = vunpack.c.l.bf16 %v1757_v9 }
 0x1e3   : > { %v1250_v24 = vld [vmem:[#allocation2 + $0x20] sm:$0xff]  ;;  %v1275_v21 = vadd.f32 %v2739_v12, %v1252_v43  ;;  %v1720_v62 = vpack.c.bf16 %v1336_v48, %v1335_v47  ;;  %v1260_v14 = vld [vmem:[#allocation2 + $0x70] sm:$0xff]  ;;  %v1327_v17 = vadd.f32 %v1702_v11, %v1279_v4  ;;  %v1707_v26 = vunpack.c.h.bf16 %v1757_v9 }
 0x1e4   : > { %v1273_v28 = vadd.f32 %v2739_v12, %v1250_v24  ;;  %v1253_v33 = vld [vmem:[#allocation2 + $0x38] sm:$0xff]  ;;  %v1715_v52 = vpack.c.bf16 %v1334_v38, %v1333_v42  ;;  %v1258_v1 = vld [vmem:[#allocation2 + $0x60] sm:$0xff]  ;;  %v1341_v23 = vmax.f32 %v1325_v58, 0.0  ;;  %v1342_v24 = vmax.f32 %v1326_v6, 0.0 }
 0x1e5   : > { %v1251_v25 = vld [vmem:[#allocation2 + $0x28] sm:$0xff]  ;;  %v1276_v44 = vadd.f32 %v2739_v12, %v1253_v33  ;;  %v1323_v63 = vadd.f32 %v1694_v49, %v1275_v21  ;;  %1759 = vst [vmem:[#allocation11 + $0x8] sm:$0xff] %v1720_v62   ;;  %v1281_v54 = vadd.f32 %v2739_v12, %v1258_v1  ;;  %v1261_v15 = vld [vmem:[#allocation2 + $0x78] sm:$0xff]  ;;  %v1343_v27 = vmax.f32 %v1327_v17, 0.0 }
 0x1e6   : > { %v1274_v31 = vadd.f32 %v2739_v12, %v1251_v25  ;;  %v1321_v30 = vadd.f32 %v1690_v36, %v1273_v28  ;;  %1716 = vst [vmem:[#allocation11] sm:$0xff] %v1715_v52   ;;  %v1259_v5 = vld [vmem:[#allocation2 + $0x68] sm:$0xff]  ;;  %v1328_v25 = vadd.f32 %v1703_v13, %v1280_v53  ;;  %v1284_v32 = vadd.f32 %v2739_v12, %v1261_v15 }
 0x1e7   : > { %v1324_v7 = vadd.f32 %v1695_v22, %v1276_v44  ;;  %v1339_v10 = vmax.f32 %v1323_v63, 0.0  ;;  %v1282_v18 = vadd.f32 %v2739_v12, %v1259_v5  ;;  %v1329_v28 = vadd.f32 %v1706_v19, %v1281_v54 }
 0x1e8   : > { %v1322_v45 = vadd.f32 %v1691_v37, %v1274_v31  ;;  %v1337_v55 = vmax.f32 %v1321_v30, 0.0  ;;  %v1283_v31 = vadd.f32 %v2739_v12, %v1260_v14  ;;  %v1735_v43 = vpack.c.bf16 %v1342_v24, %v1341_v23 }
 0x1e9   : > { %v1340_v8 = vmax.f32 %v1324_v7, 0.0  ;;  %v1344_v33 = vmax.f32 %v1328_v25, 0.0  ;;  %v1330_v34 = vadd.f32 %v1707_v26, %v1282_v18  ;;  %v1710_v35 = vunpack.c.l.bf16 %v1758_v20 }
 0x1ea   : > { %v1338_v56 = vmax.f32 %v1322_v45, 0.0  ;;  %v1345_v36 = vmax.f32 %v1329_v28, 0.0  ;;  %v1711_v37 = vunpack.c.h.bf16 %v1758_v20  ;;  %1762 = vst [vmem:[#allocation11 + $0x20] sm:$0xff] %v1735_v43  }
 0x1eb   : > { %v1730_v16 = vpack.c.bf16 %v1340_v8, %v1339_v10  ;;  %v1740_v29 = vpack.c.bf16 %v1344_v33, %v1343_v27  ;;  %v1346_v39 = vmax.f32 %v1330_v34, 0.0  ;;  %v1331_v40 = vadd.f32 %v1710_v35, %v1283_v31 }
 0x1ec   : > { %v1725_v2 = vpack.c.bf16 %v1338_v56, %v1337_v55  ;;  %v1332_v21 = vadd.f32 %v1711_v37, %v1284_v32 }
 0x1ed   : > { %1761 = vst [vmem:[#allocation11 + $0x18] sm:$0xff] %v1730_v16   ;;  %1763 = vst [vmem:[#allocation11 + $0x28] sm:$0xff] %v1740_v29   ;;  %v1745_v44 = vpack.c.bf16 %v1346_v39, %v1345_v36  ;;  %v1347_v41 = vmax.f32 %v1331_v40, 0.0 }
 0x1ee   : > { %1760 = vst [vmem:[#allocation11 + $0x10] sm:$0xff] %v1725_v2   ;;  %v1348_v42 = vmax.f32 %v1332_v21, 0.0 }
 0x1ef   : > { %1764 = vst [vmem:[#allocation11 + $0x30] sm:$0xff] %v1745_v44  }
 0x1f0   : > { %v1750_v38 = vpack.c.bf16 %v1348_v42, %v1347_v41 }
 0x1f2   : > { %1765 = vst [vmem:[#allocation11 + $0x38] sm:$0xff] %v1750_v38  }
 0x1f3 PF: > { %p1996_p1 = scmp.eq.s32.totalorder %s2430_s21, 1  ;;  %s2373_s18 = smov [#allocation11]  }
 0x1f4   : > { %s1438_s23 = sshll.u32 %s2373_s18, 4  ;;  %s1439_s23 = int_to_ptr.vmem [resolvable:$true] %s1438_s23 }
 0x1f5   : > { %s2269_s24 = scalar_lea.vmem %s1439_s23, 1024  ;;  %p2276_p7 = scmp.lt.s32.totalorder %s1439_s23, %s1439_s23 }
 0x1f6   : > { %p2270_p2 = scmp.ne.s32.totalorder %s1439_s23, %s2269_s24  ;;  %p2277_p9 = scmp.lt.s32.totalorder %s2269_s24, %s2269_s24 }
 0x1f8   : > { %p2271_p12 = pnand %p2270_p2, %p1996_p1  ;;  %p2278_p6 = por %p2277_p9, %p2276_p7 }
 0x1fa   : > { %p2272_p4 = pneg %p2271_p12 }
 0x1fc   : > { %p2279_p5 = pnand %p2278_p6, %p2272_p4 }
 0x1fe   : > { %2282 = shalt.err (!%p2279_p5)
}
 0x1ff   : > { %s2283_s26 = scalar_lea.hbm %s2802_s4, 1024 }
 0x200   : > { %p2284_p3 = scmp.ne.s32.totalorder %s2802_s4, %s2283_s26  ;;  %p2289_p11 = scmp.lt.u32.totalorder %s2283_s26, %s2802_s4 }
 0x202   : > { %p2285_p10 = pnand %p2284_p3, %p1996_p1 }
 0x204   : > { %p2286_p0 = pneg %p2285_p10 }
 0x206   : > { %p2291_p13 = pnand %p2289_p11, %p2286_p0 }
 0x208   : > { %2294 = shalt.err (!%p2291_p13)
}
 0x209   : > { %s2374_s30 = smov 64   ;;  %s2375_s0 = smov 4  }
 0x20a   : > { %1974 = dma.vmem_to_hbm [thread:$0]  (%p1996_p1), %s1439_s23, 1024, %s2802_s4, [#allocation5], %s2374_s30, %s2374_s30, %s2375_s0  }
 0x20b   : > { %2336 = dma.done.wait (%p1996_p1), [#allocation5], 1024  }
 0x20c   : > { %2338 = vsyncadd (%p1996_p1), [#allocation5], 4294966272 }
 0x20d PF: > { %s22_s20 = sadd.s32 1, %s2361_s20   ;;  %s2824_s13 = smov %s2831_s15 }
 0x20e   : > { %p19_p8 = scmp.ge.s32.totalorder %s22_s20, 4   ;;  %s2825_s15 = smov %s2345_s16 }
 0x20f   : > { %s2826_s16 = smov %s2349_s17  ;;  %s2827_s17 = smov %s2528_s9 }
 0x210   : > { %s2828_s18 = smov %s2357_s19  ;;  %s2829_s19 = smov %s2824_s13 }
 0x211   :  { %21 = sbr.rel (!%p19_p8) target bundleno = 10 (0xa), region = 104 }
 0x218   :  { %1454 = vsyncpa [#allocation4], 1 }
 0x219   :  { %1456 = vsyncpa [#allocation4 + $0x1], 1 }
 0x21a   :  { %1457 = vsyncpa [#allocation7], 1 }
 0x21b   :  { %1459 = vsyncpa [#allocation7 + $0x1], 1 }
 0x21c   :  { %1460 = vsyncpa [#allocation10], 1 }
 0x21d   :  { %1461 = vsyncpa [#allocation5], 1 }
 0x21e   :  { %1463 = vsyncpa [#allocation5 + $0x1], 1 }

</bundles_post_ra>
